<compile_context>
chip_gen: v7x
topology: tpu7x:2x2x1
jax: 0.10.0
libtpu: 0.0.40
codegen_flags: <defaults>
</compile_context>

<pallas_src>
import functools

import jax
import jax.numpy as jnp
from jax.experimental import pallas as pl
from jax.experimental.pallas import tpu as pltpu

_EPS = 1e-5
# Switch to jnp.bfloat16 on v6e/v7x for ~2x MXU throughput (accumulation stays f32
# via preferred_element_type). Kept f32 by default for exact parity with PyTorch.
_MATMUL_DTYPE = jnp.float32

_CP_1D = pltpu.CompilerParams(dimension_semantics=("parallel",),
                              vmem_limit_bytes=32 * 1024 * 1024)
_CP_2D = pltpu.CompilerParams(dimension_semantics=("parallel", "parallel"),
                              vmem_limit_bytes=32 * 1024 * 1024)


# --------------------------------------------------------------------------
# Kernel bodies
# --------------------------------------------------------------------------
def _matmul_stats(patches, w_ref, HoWo, out_ref, sum_ref, sq_ref):
    """Single im2col matmul + per-channel sum / sum-of-squares epilogue."""
    pm = patches[0] if len(patches) == 1 else jnp.concatenate(patches, axis=-1)
    pm = pm.reshape(HoWo, -1).astype(_MATMUL_DTYPE)
    y = jnp.dot(pm, w_ref[...].astype(_MATMUL_DTYPE),
                preferred_element_type=jnp.float32)
    out_ref[0] = y.astype(out_ref.dtype)
    sum_ref[0] = jnp.sum(y, axis=0, keepdims=True)
    sq_ref[0] = jnp.sum(y * y, axis=0, keepdims=True)


def _make_conv_kernel(KH, KW, stride, pad, Ho, Wo, with_shortcut):
    """3x3 conv (stride 1 or 2) over a phase-split padded input, optionally fused
    with the 1x1 strided shortcut conv (which reads the same input block)."""
    def kernel(*refs):
        if with_shortcut:
            (ph_ref, w_ref, wsc_ref,
             out_ref, s_ref, q_ref, osc_ref, ssc_ref, qsc_ref) = refs
        else:
            ph_ref, w_ref, out_ref, s_ref, q_ref = refs
        patches = []
        for kh in range(KH):
            for kw in range(KW):
                phase = (kh % stride) * stride + (kw % stride)
                patches.append(ph_ref[0, phase,
                                      pl.ds(kh // stride, Ho),
                                      pl.ds(kw // stride, Wo), :])
        _matmul_stats(patches, w_ref, Ho * Wo, out_ref, s_ref, q_ref)
        if with_shortcut:
            phr = pad % stride
            off = pad // stride
            xs = ph_ref[0, phr * stride + phr, pl.ds(off, Ho), pl.ds(off, Wo), :]
            _matmul_stats([xs], wsc_ref, Ho * Wo, osc_ref, ssc_ref, qsc_ref)
    return kernel


def _make_conv_bn_in_kernel(KH, KW, pad, Ho, Wo, Cin):
    """Stride-1 3x3 conv whose prologue applies BN(scale,shift)+ReLU to the raw
    zero-padded previous conv output and re-zeroes the padding ring."""
    Hp, Wp = Ho + 2 * pad, Wo + 2 * pad

    def kernel(x_ref, scale_ref, shift_ref, w_ref, out_ref, s_ref, q_ref):
        x = x_ref[0].astype(jnp.float32)                       # (Hp, Wp, Cin)
        scale = scale_ref[...].reshape(1, 1, Cin)
        shift = shift_ref[...].reshape(1, 1, Cin)
        xn = jnp.maximum(x * scale + shift, 0.0)
        r = jax.lax.broadcasted_iota(jnp.int32, (Hp, Wp, 1), 0)
        c = jax.lax.broadcasted_iota(jnp.int32, (Hp, Wp, 1), 1)
        interior = (r >= pad) & (r < Hp - pad) & (c >= pad) & (c < Wp - pad)
        xn = jnp.where(interior, xn, 0.0)                      # keep zero padding
        patches = [xn[kh:kh + Ho, kw:kw + Wo, :]
                   for kh in range(KH) for kw in range(KW)]
        _matmul_stats(patches, w_ref, Ho * Wo, out_ref, s_ref, q_ref)
    return kernel


def _make_residual_kernel(conv_shortcut):
    """out = relu(a*scale_a + shift_a + (b*scale_b + shift_b  |  b))."""
    def kernel(*refs):
        if conv_shortcut:
            a_ref, b_ref, sa_ref, ta_ref, sb_ref, tb_ref, o_ref = refs
        else:
            a_ref, b_ref, sa_ref, ta_ref, o_ref = refs
        a = a_ref[0].astype(jnp.float32) * sa_ref[...] + ta_ref[...]
        b = b_ref[0].astype(jnp.float32)
        if conv_shortcut:
            b = b * sb_ref[...] + tb_ref[...]
        o_ref[0] = jnp.maximum(a + b, 0.0).astype(o_ref.dtype)
    return kernel


# --------------------------------------------------------------------------
# pallas_call wrappers
# --------------------------------------------------------------------------
def _phase_split(xp, stride):
    """(N,Hp,Wp,C) padded input -> (N, s*s, ceil(Hp/s), ceil(Wp/s), C) so that every
    stride-s conv tap becomes a contiguous slice (no strided loads in-kernel)."""
    if stride == 1:
        return xp[:, None]
    N, Hp, Wp, C = xp.shape
    eh, ew = (-Hp) % stride, (-Wp) % stride
    if eh or ew:
        xp = jnp.pad(xp, ((0, 0), (0, eh), (0, ew), (0, 0)))
    phases = [xp[:, i::stride, j::stride, :]
              for i in range(stride) for j in range(stride)]
    return jnp.stack(phases, axis=1)


def _row_tile(total, target=1024):
    if total <= target:
        return total
    for t in range(target, 7, -1):
        if t % 8 == 0 and total % t == 0:
            return t
    return total


def conv3x3_stats(x_nhwc, w, w_sc=None, *, stride, pad=1):
    """3x3 conv (+ fused 1x1 shortcut conv) with per-channel sum/sumsq epilogue."""
    N, H, W, Cin = x_nhwc.shape
    KH, KW, _, Cout = w.shape
    Hp, Wp = H + 2 * pad, W + 2 * pad
    Ho = (Hp - KH) // stride + 1
    Wo = (Wp - KW) // stride + 1
    xp = jnp.pad(x_nhwc, ((0, 0), (pad, pad), (pad, pad), (0, 0)))
    phases = _phase_split(xp, stride)
    _, SS, Hph, Wph, _ = phases.shape

    with_sc = w_sc is not None
    in_specs = [
        pl.BlockSpec((1, SS, Hph, Wph, Cin), lambda n: (n, 0, 0, 0, 0)),
        pl.BlockSpec((KH * KW * Cin, Cout), lambda n: (0, 0)),
    ]
    args = [phases, w.reshape(KH * KW * Cin, Cout)]
    out_shape = [
        jax.ShapeDtypeStruct((N, Ho * Wo, Cout), x_nhwc.dtype),
        jax.ShapeDtypeStruct((N, 1, Cout), jnp.float32),
        jax.ShapeDtypeStruct((N, 1, Cout), jnp.float32),
    ]
    out_specs = [
        pl.BlockSpec((1, Ho * Wo, Cout), lambda n: (n, 0, 0)),
        pl.BlockSpec((1, 1, Cout), lambda n: (n, 0, 0)),
        pl.BlockSpec((1, 1, Cout), lambda n: (n, 0, 0)),
    ]
    if with_sc:
        Csc = w_sc.shape[-1]
        in_specs.append(pl.BlockSpec((Cin, Csc), lambda n: (0, 0)))
        args.append(w_sc.reshape(Cin, Csc))
        out_shape += [
            jax.ShapeDtypeStruct((N, Ho * Wo, Csc), x_nhwc.dtype),
            jax.ShapeDtypeStruct((N, 1, Csc), jnp.float32),
            jax.ShapeDtypeStruct((N, 1, Csc), jnp.float32),
        ]
        out_specs += [
            pl.BlockSpec((1, Ho * Wo, Csc), lambda n: (n, 0, 0)),
            pl.BlockSpec((1, 1, Csc), lambda n: (n, 0, 0)),
            pl.BlockSpec((1, 1, Csc), lambda n: (n, 0, 0)),
        ]

    outs = pl.pallas_call(
        _make_conv_kernel(KH, KW, stride, pad, Ho, Wo, with_sc),
        out_shape=tuple(out_shape),
        grid=(N,),
        in_specs=in_specs,
        out_specs=tuple(out_specs),
        compiler_params=_CP_1D,
    )(*args)
    return outs, (Ho, Wo)


def conv3x3_bn_relu_in(x_raw, scale_in, shift_in, w, *, pad=1):
    """3x3 stride-1 conv over relu(x_raw*scale_in + shift_in) (BN1+ReLU fused in
    the prologue), with the same sum/sumsq epilogue."""
    N, Ho, Wo, Cin = x_raw.shape
    KH, KW, _, Cout = w.shape
    Hp, Wp = Ho + 2 * pad, Wo + 2 * pad
    xp = jnp.pad(x_raw, ((0, 0), (pad, pad), (pad, pad), (0, 0)))
    return pl.pallas_call(
        _make_conv_bn_in_kernel(KH, KW, pad, Ho, Wo, Cin),
        out_shape=(
            jax.ShapeDtypeStruct((N, Ho * Wo, Cout), x_raw.dtype),
            jax.ShapeDtypeStruct((N, 1, Cout), jnp.float32),
            jax.ShapeDtypeStruct((N, 1, Cout), jnp.float32),
        ),
        grid=(N,),
        in_specs=[
            pl.BlockSpec((1, Hp, Wp, Cin), lambda n: (n, 0, 0, 0)),
            pl.BlockSpec((1, Cin), lambda n: (0, 0)),
            pl.BlockSpec((1, Cin), lambda n: (0, 0)),
            pl.BlockSpec((KH * KW * Cin, Cout), lambda n: (0, 0)),
        ],
        out_specs=(
            pl.BlockSpec((1, Ho * Wo, Cout), lambda n: (n, 0, 0)),
            pl.BlockSpec((1, 1, Cout), lambda n: (n, 0, 0)),
            pl.BlockSpec((1, 1, Cout), lambda n: (n, 0, 0)),
        ),
        compiler_params=_CP_1D,
    )(xp, scale_in.reshape(1, Cin), shift_in.reshape(1, Cin),
      w.reshape(KH * KW * Cin, Cout))


def residual_bn_relu(a, b, scale_a, shift_a, scale_b=None, shift_b=None):
    """relu(BN_a(a) + (BN_b(b) | b)) over (N, HW, C), tiled across rows."""
    N, HW, C = a.shape
    TR = _row_tile(HW)
    conv_sc = scale_b is not None
    in_specs = [
        pl.BlockSpec((1, TR, C), lambda n, t: (n, t, 0)),
        pl.BlockSpec((1, TR, C), lambda n, t: (n, t, 0)),
        pl.BlockSpec((1, C), lambda n, t: (0, 0)),
        pl.BlockSpec((1, C), lambda n, t: (0, 0)),
    ]
    args = [a, b, scale_a.reshape(1, C), shift_a.reshape(1, C)]
    if conv_sc:
        in_specs += [pl.BlockSpec((1, C), lambda n, t: (0, 0)),
                     pl.BlockSpec((1, C), lambda n, t: (0, 0))]
        args += [scale_b.reshape(1, C), shift_b.reshape(1, C)]
    return pl.pallas_call(
        _make_residual_kernel(conv_sc),
        out_shape=jax.ShapeDtypeStruct((N, HW, C), a.dtype),
        grid=(N, HW // TR),
        in_specs=in_specs,
        out_specs=pl.BlockSpec((1, TR, C), lambda n, t: (n, t, 0)),
        compiler_params=_CP_2D,
    )(*args)


def _bn_scale_shift(psum, psq, gamma, beta, count):
    """Fold training-mode batch stats into a per-channel affine (scale, shift)."""
    s = jnp.sum(psum, axis=(0, 1))
    q = jnp.sum(psq, axis=(0, 1))
    mean = s / count
    var = jnp.maximum(q / count - mean * mean, 0.0)   # clamp one-pass variance
    scale = gamma * jax.lax.rsqrt(var + _EPS)
    shift = beta - mean * scale
    return scale, shift


# --------------------------------------------------------------------------
# BasicBlock wrapper (NCHW in / NCHW out, like PyTorch)
# --------------------------------------------------------------------------
def init_basic_block_params(key, in_channels, out_channels, stride):
    ks = jax.random.split(key, 8)
    p = {
        # PyTorch weights are (Cout, Cin, KH, KW); we keep kernels in (KH, KW, Cin, Cout)
        "w1": 0.1 * jax.random.normal(ks[0], (3, 3, in_channels, out_channels), jnp.float32),
        "g1": 1.0 + 0.1 * jax.random.normal(ks[1], (out_channels,), jnp.float32),
        "b1": 0.1 * jax.random.normal(ks[2], (out_channels,), jnp.float32),
        "w2": 0.1 * jax.random.normal(ks[3], (3, 3, out_channels, out_channels), jnp.float32),
        "g2": 1.0 + 0.1 * jax.random.normal(ks[4], (out_channels,), jnp.float32),
        "b2": 0.1 * jax.random.normal(ks[5], (out_channels,), jnp.float32),
    }
    if stride != 1 or in_channels != out_channels:
        p["w_sc"] = 0.1 * jax.random.normal(ks[6], (1, 1, in_channels, out_channels), jnp.float32)
        p["g_sc"] = 1.0 + 0.05 * jax.random.normal(ks[7], (out_channels,), jnp.float32)
        p["b_sc"] = jnp.zeros((out_channels,), jnp.float32)
    return p


@functools.partial(jax.jit, static_argnames=("stride",))
def basic_block_forward(x_nchw, params, *, stride):
    x = jnp.transpose(x_nchw, (0, 2, 3, 1))                      # NCHW -> NHWC
    N, H, W, Cin = x.shape
    Cout = params["w1"].shape[-1]
    w_sc = params.get("w_sc")

    # conv1 (+ fused 1x1 shortcut conv) with fused BN statistics.
    outs, (Ho, Wo) = conv3x3_stats(x, params["w1"], w_sc, stride=stride, pad=1)
    if w_sc is not None:
        out1, s1, q1, out_sc, s_sc, q_sc = outs
    else:
        out1, s1, q1 = outs

    count = N * Ho * Wo
    scale1, shift1 = _bn_scale_shift(s1, q1, params["g1"], params["b1"], count)

    # conv2 with BN1+ReLU fused in its prologue.
    out2, s2, q2 = conv3x3_bn_relu_in(out1.reshape(N, Ho, Wo, Cout),
                                      scale1, shift1, params["w2"], pad=1)
    scale2, shift2 = _bn_scale_shift(s2, q2, params["g2"], params["b2"], count)

    # Fused BN2 (+ shortcut BN) + residual add + ReLU.
    if w_sc is not None:
        scale_sc, shift_sc = _bn_scale_shift(s_sc, q_sc,
                                             params["g_sc"], params["b_sc"], count)
        y = residual_bn_relu(out2, out_sc, scale2, shift2, scale_sc, shift_sc)
    else:
        y = residual_bn_relu(out2, x.reshape(N, H * W, Cin), scale2, shift2)

    return jnp.transpose(y.reshape(N, Ho, Wo, Cout), (0, 3, 1, 2))   # NHWC -> NCHW


# --------------------------------------------------------------------------
# Pure-JAX reference (same training-mode BN semantics) for validation
# --------------------------------------------------------------------------
def _reference_block(x_nchw, params, stride):
    def conv(x, w, s, pad):
        return jax.lax.conv_general_dilated(
            x, w, window_strides=(s, s), padding=[(pad, pad), (pad, pad)],
            dimension_numbers=("NHWC", "HWIO", "NHWC"))

    def bn(x, g, b):
        mean = jnp.mean(x, axis=(0, 1, 2))
        var = jnp.mean((x - mean) ** 2, axis=(0, 1, 2))
        return (x - mean) * jax.lax.rsqrt(var + _EPS) * g + b

    xh = jnp.transpose(x_nchw, (0, 2, 3, 1))
    y = jax.nn.relu(bn(conv(xh, params["w1"], stride, 1), params["g1"], params["b1"]))
    y = bn(conv(y, params["w2"], 1, 1), params["g2"], params["b2"])
    if "w_sc" in params:
        sc = bn(conv(xh, params["w_sc"], stride, 0), params["g_sc"], params["b_sc"])
    else:
        sc = xh
    return jnp.transpose(jax.nn.relu(y + sc), (0, 3, 1, 2))


if __name__ == "__main__":
    key = jax.random.PRNGKey(0)
    kx, kp1, kp2 = jax.random.split(key, 3)

    x = jax.random.normal(kx, (2, 4, 16, 16), jnp.float32)  # NCHW

    # Case 1: downsampling block (stride=2, 4 -> 8 channels) -> conv shortcut.
    params_ds = init_basic_block_params(kp1, in_channels=4, out_channels=8, stride=2)
    y_ds = basic_block_forward(x, params_ds, stride=2)
    jax.block_until_ready(y_ds)
    ref_ds = _reference_block(x, params_ds, stride=2)
    assert y_ds.shape == (2, 8, 8, 8)
    assert bool(jnp.all(jnp.isfinite(y_ds))) and bool(jnp.all(y_ds >= 0.0))
    assert bool(jnp.allclose(y_ds, ref_ds, atol=5e-2, rtol=5e-2))

    # Case 2: identity-shortcut block (stride=1, same channels).
    params_id = init_basic_block_params(kp2, in_channels=4, out_channels=4, stride=1)
    y_id = basic_block_forward(x, params_id, stride=1)
    jax.block_until_ready(y_id)
    ref_id = _reference_block(x, params_id, stride=1)
    assert y_id.shape == (2, 4, 16, 16)
    assert bool(jnp.all(jnp.isfinite(y_id))) and bool(jnp.all(y_id >= 0.0))
    assert bool(jnp.allclose(y_id, ref_id, atol=5e-2, rtol=5e-2))

    print("KERNEL_OK")
</pallas_src>

<mosaic_0001>
module attributes {stable_mosaic.version = 11 : i64} {
  func.func @kernel(%arg0: i32, %arg1: memref<1x4x9x9x4xf32, #tpu.memory_space<vmem>>, %arg2: memref<36x8xf32, #tpu.memory_space<vmem>>, %arg3: memref<4x8xf32, #tpu.memory_space<vmem>>, %arg4: memref<1x64x8xf32, #tpu.memory_space<vmem>>, %arg5: memref<1x1x8xf32, #tpu.memory_space<vmem>>, %arg6: memref<1x1x8xf32, #tpu.memory_space<vmem>>, %arg7: memref<1x64x8xf32, #tpu.memory_space<vmem>>, %arg8: memref<1x1x8xf32, #tpu.memory_space<vmem>>, %arg9: memref<1x1x8xf32, #tpu.memory_space<vmem>>) attributes {dimension_semantics = [#tpu.dimension_semantics<parallel>], iteration_bounds = array<i64: 2>, scalar_prefetch = 0 : i64, scratch_operands = 0 : i64, tpu.core_type = #tpu.core_type<tc>, window_params = [{transform_indices = @transform_0, window_bounds = array<i64: 1, 4, 9, 9, 4>}, {pipeline_mode = #tpu.pipeline_mode<synchronous>, transform_indices = @transform_1, window_bounds = array<i64: 36, 8>}, {pipeline_mode = #tpu.pipeline_mode<synchronous>, transform_indices = @transform_2, window_bounds = array<i64: 4, 8>}, {transform_indices = @transform_3, window_bounds = array<i64: 1, 64, 8>}, {transform_indices = @transform_4, window_bounds = array<i64: 1, 1, 8>}, {transform_indices = @transform_5, window_bounds = array<i64: 1, 1, 8>}, {transform_indices = @transform_6, window_bounds = array<i64: 1, 64, 8>}, {transform_indices = @transform_7, window_bounds = array<i64: 1, 1, 8>}, {transform_indices = @transform_8, window_bounds = array<i64: 1, 1, 8>}]} {
    %c0 = arith.constant 0 : index
    %c0_0 = arith.constant 0 : index
    %c0_1 = arith.constant 0 : index
    %c0_2 = arith.constant 0 : index
    %c0_3 = arith.constant 0 : index
    %0 = vector.load %arg1[%c0, %c0_0, %c0_1, %c0_2, %c0_3] : memref<1x4x9x9x4xf32, #tpu.memory_space<vmem>>, vector<1x1x8x8x4xf32>
    %1 = vector.shape_cast %0 : vector<1x1x8x8x4xf32> to vector<8x8x4xf32>
    %c0_4 = arith.constant 0 : index
    %c1 = arith.constant 1 : index
    %c0_5 = arith.constant 0 : index
    %c0_6 = arith.constant 0 : index
    %c0_7 = arith.constant 0 : index
    %2 = vector.load %arg1[%c0_4, %c1, %c0_5, %c0_6, %c0_7] : memref<1x4x9x9x4xf32, #tpu.memory_space<vmem>>, vector<1x1x8x8x4xf32>
    %3 = vector.shape_cast %2 : vector<1x1x8x8x4xf32> to vector<8x8x4xf32>
    %c0_8 = arith.constant 0 : index
    %c0_9 = arith.constant 0 : index
    %c0_10 = arith.constant 0 : index
    %c1_11 = arith.constant 1 : index
    %c0_12 = arith.constant 0 : index
    %4 = vector.load %arg1[%c0_8, %c0_9, %c0_10, %c1_11, %c0_12] : memref<1x4x9x9x4xf32, #tpu.memory_space<vmem>>, vector<1x1x8x8x4xf32>
    %5 = vector.shape_cast %4 : vector<1x1x8x8x4xf32> to vector<8x8x4xf32>
    %c0_13 = arith.constant 0 : index
    %c2 = arith.constant 2 : index
    %c0_14 = arith.constant 0 : index
    %c0_15 = arith.constant 0 : index
    %c0_16 = arith.constant 0 : index
    %6 = vector.load %arg1[%c0_13, %c2, %c0_14, %c0_15, %c0_16] : memref<1x4x9x9x4xf32, #tpu.memory_space<vmem>>, vector<1x1x8x8x4xf32>
    %7 = vector.shape_cast %6 : vector<1x1x8x8x4xf32> to vector<8x8x4xf32>
    %c0_17 = arith.constant 0 : index
    %c3 = arith.constant 3 : index
    %c0_18 = arith.constant 0 : index
    %c0_19 = arith.constant 0 : index
    %c0_20 = arith.constant 0 : index
    %8 = vector.load %arg1[%c0_17, %c3, %c0_18, %c0_19, %c0_20] : memref<1x4x9x9x4xf32, #tpu.memory_space<vmem>>, vector<1x1x8x8x4xf32>
    %9 = vector.shape_cast %8 : vector<1x1x8x8x4xf32> to vector<8x8x4xf32>
    %c0_21 = arith.constant 0 : index
    %c2_22 = arith.constant 2 : index
    %c0_23 = arith.constant 0 : index
    %c1_24 = arith.constant 1 : index
    %c0_25 = arith.constant 0 : index
    %10 = vector.load %arg1[%c0_21, %c2_22, %c0_23, %c1_24, %c0_25] : memref<1x4x9x9x4xf32, #tpu.memory_space<vmem>>, vector<1x1x8x8x4xf32>
    %11 = vector.shape_cast %10 : vector<1x1x8x8x4xf32> to vector<8x8x4xf32>
    %c0_26 = arith.constant 0 : index
    %c0_27 = arith.constant 0 : index
    %c1_28 = arith.constant 1 : index
    %c0_29 = arith.constant 0 : index
    %c0_30 = arith.constant 0 : index
    %12 = vector.load %arg1[%c0_26, %c0_27, %c1_28, %c0_29, %c0_30] : memref<1x4x9x9x4xf32, #tpu.memory_space<vmem>>, vector<1x1x8x8x4xf32>
    %13 = vector.shape_cast %12 : vector<1x1x8x8x4xf32> to vector<8x8x4xf32>
    %c0_31 = arith.constant 0 : index
    %c1_32 = arith.constant 1 : index
    %c1_33 = arith.constant 1 : index
    %c0_34 = arith.constant 0 : index
    %c0_35 = arith.constant 0 : index
    %14 = vector.load %arg1[%c0_31, %c1_32, %c1_33, %c0_34, %c0_35] : memref<1x4x9x9x4xf32, #tpu.memory_space<vmem>>, vector<1x1x8x8x4xf32>
    %15 = vector.shape_cast %14 : vector<1x1x8x8x4xf32> to vector<8x8x4xf32>
    %c0_36 = arith.constant 0 : index
    %c0_37 = arith.constant 0 : index
    %c1_38 = arith.constant 1 : index
    %c1_39 = arith.constant 1 : index
    %c0_40 = arith.constant 0 : index
    %16 = vector.load %arg1[%c0_36, %c0_37, %c1_38, %c1_39, %c0_40] : memref<1x4x9x9x4xf32, #tpu.memory_space<vmem>>, vector<1x1x8x8x4xf32>
    %17 = vector.shape_cast %16 : vector<1x1x8x8x4xf32> to vector<8x8x4xf32>
    %18 = tpu.concatenate %1, %3, %5, %7, %9, %11, %13, %15, %17 in 2 : vector<8x8x4xf32>, vector<8x8x4xf32>, vector<8x8x4xf32>, vector<8x8x4xf32>, vector<8x8x4xf32>, vector<8x8x4xf32>, vector<8x8x4xf32>, vector<8x8x4xf32>, vector<8x8x4xf32> -> vector<8x8x36xf32>
    %19 = vector.shape_cast %18 : vector<8x8x36xf32> to vector<64x36xf32>
    %c0_41 = arith.constant 0 : index
    %c0_42 = arith.constant 0 : index
    %20 = vector.load %arg2[%c0_41, %c0_42] : memref<36x8xf32, #tpu.memory_space<vmem>>, vector<36x8xf32>
    %cst = arith.constant dense<0.000000e+00> : vector<64x8xf32>
    %21 = tpu.matmul %19, %20, %cst {dimension_numbers = #tpu.dot_dimension_numbers<[1], [0], [0], [1], [0, 0, 1, 1], [], []>} : vector<64x36xf32>, vector<36x8xf32>, vector<64x8xf32> -> vector<64x8xf32>
    %c0_43 = arith.constant 0 : index
    %c0_44 = arith.constant 0 : index
    %c0_45 = arith.constant 0 : index
    %22 = vector.load %arg4[%c0_43, %c0_44, %c0_45] : memref<1x64x8xf32, #tpu.memory_space<vmem>>, vector<1x64x8xf32>
    %23 = vector.shape_cast %22 : vector<1x64x8xf32> to vector<64x8xf32>
    %24 = vector.shape_cast %21 : vector<64x8xf32> to vector<1x64x8xf32>
    tpu.vector_store %arg4[%c0_43, %c0_44, %c0_45], %24 {strides = array<i32>} : memref<1x64x8xf32, #tpu.memory_space<vmem>>, vector<1x64x8xf32>,
    %cst_46 = arith.constant dense<0.000000e+00> : vector<8xf32>
    %25 = vector.multi_reduction <add>, %21, %cst_46 [0] : vector<64x8xf32> to vector<8xf32>
    %26 = vector.shape_cast %25 : vector<8xf32> to vector<1x8xf32>
    %c0_47 = arith.constant 0 : index
    %c0_48 = arith.constant 0 : index
    %c0_49 = arith.constant 0 : index
    %27 = vector.load %arg5[%c0_47, %c0_48, %c0_49] : memref<1x1x8xf32, #tpu.memory_space<vmem>>, vector<1x1x8xf32>
    %28 = vector.shape_cast %27 : vector<1x1x8xf32> to vector<1x8xf32>
    %29 = vector.shape_cast %26 : vector<1x8xf32> to vector<1x1x8xf32>
    tpu.vector_store %arg5[%c0_47, %c0_48, %c0_49], %29 {strides = array<i32>} : memref<1x1x8xf32, #tpu.memory_space<vmem>>, vector<1x1x8xf32>,
    %30 = arith.mulf %21, %21 : vector<64x8xf32>
    %cst_50 = arith.constant dense<0.000000e+00> : vector<8xf32>
    %31 = vector.multi_reduction <add>, %30, %cst_50 [0] : vector<64x8xf32> to vector<8xf32>
    %32 = vector.shape_cast %31 : vector<8xf32> to vector<1x8xf32>
    %c0_51 = arith.constant 0 : index
    %c0_52 = arith.constant 0 : index
    %c0_53 = arith.constant 0 : index
    %33 = vector.load %arg6[%c0_51, %c0_52, %c0_53] : memref<1x1x8xf32, #tpu.memory_space<vmem>>, vector<1x1x8xf32>
    %34 = vector.shape_cast %33 : vector<1x1x8xf32> to vector<1x8xf32>
    %35 = vector.shape_cast %32 : vector<1x8xf32> to vector<1x1x8xf32>
    tpu.vector_store %arg6[%c0_51, %c0_52, %c0_53], %35 {strides = array<i32>} : memref<1x1x8xf32, #tpu.memory_space<vmem>>, vector<1x1x8xf32>,
    %c0_54 = arith.constant 0 : index
    %c3_55 = arith.constant 3 : index
    %c0_56 = arith.constant 0 : index
    %c0_57 = arith.constant 0 : index
    %c0_58 = arith.constant 0 : index
    %36 = vector.load %arg1[%c0_54, %c3_55, %c0_56, %c0_57, %c0_58] : memref<1x4x9x9x4xf32, #tpu.memory_space<vmem>>, vector<1x1x8x8x4xf32>
    %37 = vector.shape_cast %36 : vector<1x1x8x8x4xf32> to vector<8x8x4xf32>
    %38 = vector.shape_cast %37 : vector<8x8x4xf32> to vector<64x4xf32>
    %c0_59 = arith.constant 0 : index
    %c0_60 = arith.constant 0 : index
    %39 = vector.load %arg3[%c0_59, %c0_60] : memref<4x8xf32, #tpu.memory_space<vmem>>, vector<4x8xf32>
    %cst_61 = arith.constant dense<0.000000e+00> : vector<64x8xf32>
    %40 = tpu.matmul %38, %39, %cst_61 {dimension_numbers = #tpu.dot_dimension_numbers<[1], [0], [0], [1], [0, 0, 1, 1], [], []>} : vector<64x4xf32>, vector<4x8xf32>, vector<64x8xf32> -> vector<64x8xf32>
    %c0_62 = arith.constant 0 : index
    %c0_63 = arith.constant 0 : index
    %c0_64 = arith.constant 0 : index
    %41 = vector.load %arg7[%c0_62, %c0_63, %c0_64] : memref<1x64x8xf32, #tpu.memory_space<vmem>>, vector<1x64x8xf32>
    %42 = vector.shape_cast %41 : vector<1x64x8xf32> to vector<64x8xf32>
    %43 = vector.shape_cast %40 : vector<64x8xf32> to vector<1x64x8xf32>
    tpu.vector_store %arg7[%c0_62, %c0_63, %c0_64], %43 {strides = array<i32>} : memref<1x64x8xf32, #tpu.memory_space<vmem>>, vector<1x64x8xf32>,
    %cst_65 = arith.constant dense<0.000000e+00> : vector<8xf32>
    %44 = vector.multi_reduction <add>, %40, %cst_65 [0] : vector<64x8xf32> to vector<8xf32>
    %45 = vector.shape_cast %44 : vector<8xf32> to vector<1x8xf32>
    %c0_66 = arith.constant 0 : index
    %c0_67 = arith.constant 0 : index
    %c0_68 = arith.constant 0 : index
    %46 = vector.load %arg8[%c0_66, %c0_67, %c0_68] : memref<1x1x8xf32, #tpu.memory_space<vmem>>, vector<1x1x8xf32>
    %47 = vector.shape_cast %46 : vector<1x1x8xf32> to vector<1x8xf32>
    %48 = vector.shape_cast %45 : vector<1x8xf32> to vector<1x1x8xf32>
    tpu.vector_store %arg8[%c0_66, %c0_67, %c0_68], %48 {strides = array<i32>} : memref<1x1x8xf32, #tpu.memory_space<vmem>>, vector<1x1x8xf32>,
    %49 = arith.mulf %40, %40 : vector<64x8xf32>
    %cst_69 = arith.constant dense<0.000000e+00> : vector<8xf32>
    %50 = vector.multi_reduction <add>, %49, %cst_69 [0] : vector<64x8xf32> to vector<8xf32>
    %51 = vector.shape_cast %50 : vector<8xf32> to vector<1x8xf32>
    %c0_70 = arith.constant 0 : index
    %c0_71 = arith.constant 0 : index
    %c0_72 = arith.constant 0 : index
    %52 = vector.load %arg9[%c0_70, %c0_71, %c0_72] : memref<1x1x8xf32, #tpu.memory_space<vmem>>, vector<1x1x8xf32>
    %53 = vector.shape_cast %52 : vector<1x1x8xf32> to vector<1x8xf32>
    %54 = vector.shape_cast %51 : vector<1x8xf32> to vector<1x1x8xf32>
    tpu.vector_store %arg9[%c0_70, %c0_71, %c0_72], %54 {strides = array<i32>} : memref<1x1x8xf32, #tpu.memory_space<vmem>>, vector<1x1x8xf32>,
    return
  }
  func.func @transform_0(%arg0: i32) -> (i32, i32, i32, i32, i32) {
    %c0_i32 = arith.constant 0 : i32
    %c0_i32_0 = arith.constant 0 : i32
    %c0_i32_1 = arith.constant 0 : i32
    %c0_i32_2 = arith.constant 0 : i32
    %c0_i32_3 = arith.constant 0 : i32
    return %arg0, %c0_i32, %c0_i32_0, %c0_i32_1, %c0_i32_2 : i32, i32, i32, i32, i32
  }
  func.func @transform_1(%arg0: i32) -> (i32, i32) {
    %c0_i32 = arith.constant 0 : i32
    %c0_i32_0 = arith.constant 0 : i32
    %c0_i32_1 = arith.constant 0 : i32
    return %c0_i32, %c0_i32_0 : i32, i32
  }
  func.func @transform_2(%arg0: i32) -> (i32, i32) {
    %c0_i32 = arith.constant 0 : i32
    %c0_i32_0 = arith.constant 0 : i32
    %c0_i32_1 = arith.constant 0 : i32
    return %c0_i32, %c0_i32_0 : i32, i32
  }
  func.func @transform_3(%arg0: i32) -> (i32, i32, i32) {
    %c0_i32 = arith.constant 0 : i32
    %c0_i32_0 = arith.constant 0 : i32
    %c0_i32_1 = arith.constant 0 : i32
    return %arg0, %c0_i32, %c0_i32_0 : i32, i32, i32
  }
  func.func @transform_4(%arg0: i32) -> (i32, i32, i32) {
    %c0_i32 = arith.constant 0 : i32
    %c0_i32_0 = arith.constant 0 : i32
    %c0_i32_1 = arith.constant 0 : i32
    return %arg0, %c0_i32, %c0_i32_0 : i32, i32, i32
  }
  func.func @transform_5(%arg0: i32) -> (i32, i32, i32) {
    %c0_i32 = arith.constant 0 : i32
    %c0_i32_0 = arith.constant 0 : i32
    %c0_i32_1 = arith.constant 0 : i32
    return %arg0, %c0_i32, %c0_i32_0 : i32, i32, i32
  }
  func.func @transform_6(%arg0: i32) -> (i32, i32, i32) {
    %c0_i32 = arith.constant 0 : i32
    %c0_i32_0 = arith.constant 0 : i32
    %c0_i32_1 = arith.constant 0 : i32
    return %arg0, %c0_i32, %c0_i32_0 : i32, i32, i32
  }
  func.func @transform_7(%arg0: i32) -> (i32, i32, i32) {
    %c0_i32 = arith.constant 0 : i32
    %c0_i32_0 = arith.constant 0 : i32
    %c0_i32_1 = arith.constant 0 : i32
    return %arg0, %c0_i32, %c0_i32_0 : i32, i32, i32
  }
  func.func @transform_8(%arg0: i32) -> (i32, i32, i32) {
    %c0_i32 = arith.constant 0 : i32
    %c0_i32_0 = arith.constant 0 : i32
    %c0_i32_1 = arith.constant 0 : i32
    return %arg0, %c0_i32, %c0_i32_0 : i32, i32, i32
  }
}

module attributes {stable_mosaic.version = 11 : i64} {
  func.func @kernel(%arg0: i32, %arg1: memref<1x10x10x8xf32, #tpu.memory_space<vmem>>, %arg2: memref<1x8xf32, #tpu.memory_space<vmem>>, %arg3: memref<1x8xf32, #tpu.memory_space<vmem>>, %arg4: memref<72x8xf32, #tpu.memory_space<vmem>>, %arg5: memref<1x64x8xf32, #tpu.memory_space<vmem>>, %arg6: memref<1x1x8xf32, #tpu.memory_space<vmem>>, %arg7: memref<1x1x8xf32, #tpu.memory_space<vmem>>) attributes {dimension_semantics = [#tpu.dimension_semantics<parallel>], iteration_bounds = array<i64: 2>, scalar_prefetch = 0 : i64, scratch_operands = 0 : i64, tpu.core_type = #tpu.core_type<tc>, window_params = [{transform_indices = @transform_0, window_bounds = array<i64: 1, 10, 10, 8>}, {pipeline_mode = #tpu.pipeline_mode<synchronous>, transform_indices = @transform_1, window_bounds = array<i64: 1, 8>}, {pipeline_mode = #tpu.pipeline_mode<synchronous>, transform_indices = @transform_2, window_bounds = array<i64: 1, 8>}, {pipeline_mode = #tpu.pipeline_mode<synchronous>, transform_indices = @transform_3, window_bounds = array<i64: 72, 8>}, {transform_indices = @transform_4, window_bounds = array<i64: 1, 64, 8>}, {transform_indices = @transform_5, window_bounds = array<i64: 1, 1, 8>}, {transform_indices = @transform_6, window_bounds = array<i64: 1, 1, 8>}]} {
    %c0 = arith.constant 0 : index
    %c0_0 = arith.constant 0 : index
    %c0_1 = arith.constant 0 : index
    %c0_2 = arith.constant 0 : index
    %0 = vector.load %arg1[%c0, %c0_0, %c0_1, %c0_2] : memref<1x10x10x8xf32, #tpu.memory_space<vmem>>, vector<1x10x10x8xf32>
    %1 = vector.shape_cast %0 : vector<1x10x10x8xf32> to vector<10x10x8xf32>
    %c0_3 = arith.constant 0 : index
    %c0_4 = arith.constant 0 : index
    %2 = vector.load %arg2[%c0_3, %c0_4] : memref<1x8xf32, #tpu.memory_space<vmem>>, vector<1x8xf32>
    %3 = vector.shape_cast %2 : vector<1x8xf32> to vector<1x1x8xf32>
    %c0_5 = arith.constant 0 : index
    %c0_6 = arith.constant 0 : index
    %4 = vector.load %arg3[%c0_5, %c0_6] : memref<1x8xf32, #tpu.memory_space<vmem>>, vector<1x8xf32>
    %5 = vector.shape_cast %4 : vector<1x8xf32> to vector<1x1x8xf32>
    %6 = vector.broadcast %3 : vector<1x1x8xf32> to vector<10x10x8xf32>
    %7 = arith.mulf %1, %6 : vector<10x10x8xf32>
    %8 = vector.broadcast %5 : vector<1x1x8xf32> to vector<10x10x8xf32>
    %9 = arith.addf %7, %8 : vector<10x10x8xf32>
    %cst = arith.constant 0.000000e+00 : f32
    %10 = vector.broadcast %cst : f32 to vector<10x10x8xf32>
    %11 = arith.maximumf %9, %10 : vector<10x10x8xf32>
    %12 = tpu.iota {dimensions = array<i32: 0>} : vector<10x10x1xi32>
    %13 = tpu.iota {dimensions = array<i32: 1>} : vector<10x10x1xi32>
    %c1_i32 = arith.constant 1 : i32
    %14 = vector.broadcast %c1_i32 : i32 to vector<10x10x1xi32>
    %15 = arith.cmpi sge, %12, %14 : vector<10x10x1xi32>
    %c9_i32 = arith.constant 9 : i32
    %16 = vector.broadcast %c9_i32 : i32 to vector<10x10x1xi32>
    %17 = arith.cmpi slt, %12, %16 : vector<10x10x1xi32>
    %18 = arith.andi %15, %17 : vector<10x10x1xi1>
    %c1_i32_7 = arith.constant 1 : i32
    %19 = vector.broadcast %c1_i32_7 : i32 to vector<10x10x1xi32>
    %20 = arith.cmpi sge, %13, %19 : vector<10x10x1xi32>
    %21 = arith.andi %18, %20 : vector<10x10x1xi1>
    %c9_i32_8 = arith.constant 9 : i32
    %22 = vector.broadcast %c9_i32_8 : i32 to vector<10x10x1xi32>
    %23 = arith.cmpi slt, %13, %22 : vector<10x10x1xi32>
    %24 = arith.andi %21, %23 : vector<10x10x1xi1>
    %cst_9 = arith.constant 0.000000e+00 : f32
    %25 = vector.shape_cast %24 : vector<10x10x1xi1> to vector<10x10x1xi1>
    %26 = vector.broadcast %25 : vector<10x10x1xi1> to vector<10x10x8xi1>
    %27 = vector.broadcast %cst_9 : f32 to vector<10x10x8xf32>
    %28 = arith.select %26, %11, %27 : vector<10x10x8xi1>, vector<10x10x8xf32>
    %29 = vector.extract_strided_slice %28 {offsets = [0, 0, 0], sizes = [8, 8, 8], strides = [1, 1, 1]} : vector<10x10x8xf32> to vector<8x8x8xf32>
    %30 = vector.extract_strided_slice %28 {offsets = [0, 1, 0], sizes = [8, 8, 8], strides = [1, 1, 1]} : vector<10x10x8xf32> to vector<8x8x8xf32>
    %31 = vector.extract_strided_slice %28 {offsets = [0, 2, 0], sizes = [8, 8, 8], strides = [1, 1, 1]} : vector<10x10x8xf32> to vector<8x8x8xf32>
    %32 = vector.extract_strided_slice %28 {offsets = [1, 0, 0], sizes = [8, 8, 8], strides = [1, 1, 1]} : vector<10x10x8xf32> to vector<8x8x8xf32>
    %33 = vector.extract_strided_slice %28 {offsets = [1, 1, 0], sizes = [8, 8, 8], strides = [1, 1, 1]} : vector<10x10x8xf32> to vector<8x8x8xf32>
    %34 = vector.extract_strided_slice %28 {offsets = [1, 2, 0], sizes = [8, 8, 8], strides = [1, 1, 1]} : vector<10x10x8xf32> to vector<8x8x8xf32>
    %35 = vector.extract_strided_slice %28 {offsets = [2, 0, 0], sizes = [8, 8, 8], strides = [1, 1, 1]} : vector<10x10x8xf32> to vector<8x8x8xf32>
    %36 = vector.extract_strided_slice %28 {offsets = [2, 1, 0], sizes = [8, 8, 8], strides = [1, 1, 1]} : vector<10x10x8xf32> to vector<8x8x8xf32>
    %37 = vector.extract_strided_slice %28 {offsets = [2, 2, 0], sizes = [8, 8, 8], strides = [1, 1, 1]} : vector<10x10x8xf32> to vector<8x8x8xf32>
    %38 = tpu.concatenate %29, %30, %31, %32, %33, %34, %35, %36, %37 in 2 : vector<8x8x8xf32>, vector<8x8x8xf32>, vector<8x8x8xf32>, vector<8x8x8xf32>, vector<8x8x8xf32>, vector<8x8x8xf32>, vector<8x8x8xf32>, vector<8x8x8xf32>, vector<8x8x8xf32> -> vector<8x8x72xf32>
    %39 = vector.shape_cast %38 : vector<8x8x72xf32> to vector<64x72xf32>
    %c0_10 = arith.constant 0 : index
    %c0_11 = arith.constant 0 : index
    %40 = vector.load %arg4[%c0_10, %c0_11] : memref<72x8xf32, #tpu.memory_space<vmem>>, vector<72x8xf32>
    %cst_12 = arith.constant dense<0.000000e+00> : vector<64x8xf32>
    %41 = tpu.matmul %39, %40, %cst_12 {dimension_numbers = #tpu.dot_dimension_numbers<[1], [0], [0], [1], [0, 0, 1, 1], [], []>} : vector<64x72xf32>, vector<72x8xf32>, vector<64x8xf32> -> vector<64x8xf32>
    %c0_13 = arith.constant 0 : index
    %c0_14 = arith.constant 0 : index
    %c0_15 = arith.constant 0 : index
    %42 = vector.load %arg5[%c0_13, %c0_14, %c0_15] : memref<1x64x8xf32, #tpu.memory_space<vmem>>, vector<1x64x8xf32>
    %43 = vector.shape_cast %42 : vector<1x64x8xf32> to vector<64x8xf32>
    %44 = vector.shape_cast %41 : vector<64x8xf32> to vector<1x64x8xf32>
    tpu.vector_store %arg5[%c0_13, %c0_14, %c0_15], %44 {strides = array<i32>} : memref<1x64x8xf32, #tpu.memory_space<vmem>>, vector<1x64x8xf32>,
    %cst_16 = arith.constant dense<0.000000e+00> : vector<8xf32>
    %45 = vector.multi_reduction <add>, %41, %cst_16 [0] : vector<64x8xf32> to vector<8xf32>
    %46 = vector.shape_cast %45 : vector<8xf32> to vector<1x8xf32>
    %c0_17 = arith.constant 0 : index
    %c0_18 = arith.constant 0 : index
    %c0_19 = arith.constant 0 : index
    %47 = vector.load %arg6[%c0_17, %c0_18, %c0_19] : memref<1x1x8xf32, #tpu.memory_space<vmem>>, vector<1x1x8xf32>
    %48 = vector.shape_cast %47 : vector<1x1x8xf32> to vector<1x8xf32>
    %49 = vector.shape_cast %46 : vector<1x8xf32> to vector<1x1x8xf32>
    tpu.vector_store %arg6[%c0_17, %c0_18, %c0_19], %49 {strides = array<i32>} : memref<1x1x8xf32, #tpu.memory_space<vmem>>, vector<1x1x8xf32>,
    %50 = arith.mulf %41, %41 : vector<64x8xf32>
    %cst_20 = arith.constant dense<0.000000e+00> : vector<8xf32>
    %51 = vector.multi_reduction <add>, %50, %cst_20 [0] : vector<64x8xf32> to vector<8xf32>
    %52 = vector.shape_cast %51 : vector<8xf32> to vector<1x8xf32>
    %c0_21 = arith.constant 0 : index
    %c0_22 = arith.constant 0 : index
    %c0_23 = arith.constant 0 : index
    %53 = vector.load %arg7[%c0_21, %c0_22, %c0_23] : memref<1x1x8xf32, #tpu.memory_space<vmem>>, vector<1x1x8xf32>
    %54 = vector.shape_cast %53 : vector<1x1x8xf32> to vector<1x8xf32>
    %55 = vector.shape_cast %52 : vector<1x8xf32> to vector<1x1x8xf32>
    tpu.vector_store %arg7[%c0_21, %c0_22, %c0_23], %55 {strides = array<i32>} : memref<1x1x8xf32, #tpu.memory_space<vmem>>, vector<1x1x8xf32>,
    return
  }
  func.func @transform_0(%arg0: i32) -> (i32, i32, i32, i32) {
    %c0_i32 = arith.constant 0 : i32
    %c0_i32_0 = arith.constant 0 : i32
    %c0_i32_1 = arith.constant 0 : i32
    %c0_i32_2 = arith.constant 0 : i32
    return %arg0, %c0_i32, %c0_i32_0, %c0_i32_1 : i32, i32, i32, i32
  }
  func.func @transform_1(%arg0: i32) -> (i32, i32) {
    %c0_i32 = arith.constant 0 : i32
    %c0_i32_0 = arith.constant 0 : i32
    %c0_i32_1 = arith.constant 0 : i32
    return %c0_i32, %c0_i32_0 : i32, i32
  }
  func.func @transform_2(%arg0: i32) -> (i32, i32) {
    %c0_i32 = arith.constant 0 : i32
    %c0_i32_0 = arith.constant 0 : i32
    %c0_i32_1 = arith.constant 0 : i32
    return %c0_i32, %c0_i32_0 : i32, i32
  }
  func.func @transform_3(%arg0: i32) -> (i32, i32) {
    %c0_i32 = arith.constant 0 : i32
    %c0_i32_0 = arith.constant 0 : i32
    %c0_i32_1 = arith.constant 0 : i32
    return %c0_i32, %c0_i32_0 : i32, i32
  }
  func.func @transform_4(%arg0: i32) -> (i32, i32, i32) {
    %c0_i32 = arith.constant 0 : i32
    %c0_i32_0 = arith.constant 0 : i32
    %c0_i32_1 = arith.constant 0 : i32
    return %arg0, %c0_i32, %c0_i32_0 : i32, i32, i32
  }
  func.func @transform_5(%arg0: i32) -> (i32, i32, i32) {
    %c0_i32 = arith.constant 0 : i32
    %c0_i32_0 = arith.constant 0 : i32
    %c0_i32_1 = arith.constant 0 : i32
    return %arg0, %c0_i32, %c0_i32_0 : i32, i32, i32
  }
  func.func @transform_6(%arg0: i32) -> (i32, i32, i32) {
    %c0_i32 = arith.constant 0 : i32
    %c0_i32_0 = arith.constant 0 : i32
    %c0_i32_1 = arith.constant 0 : i32
    return %arg0, %c0_i32, %c0_i32_0 : i32, i32, i32
  }
}

module attributes {stable_mosaic.version = 11 : i64} {
  func.func @kernel(%arg0: i32, %arg1: i32, %arg2: memref<1x64x8xf32, #tpu.memory_space<vmem>>, %arg3: memref<1x64x8xf32, #tpu.memory_space<vmem>>, %arg4: memref<1x8xf32, #tpu.memory_space<vmem>>, %arg5: memref<1x8xf32, #tpu.memory_space<vmem>>, %arg6: memref<1x8xf32, #tpu.memory_space<vmem>>, %arg7: memref<1x8xf32, #tpu.memory_space<vmem>>, %arg8: memref<1x64x8xf32, #tpu.memory_space<vmem>>) attributes {dimension_semantics = [#tpu.dimension_semantics<parallel>, #tpu.dimension_semantics<parallel>], iteration_bounds = array<i64: 2, 1>, scalar_prefetch = 0 : i64, scratch_operands = 0 : i64, tpu.core_type = #tpu.core_type<tc>, window_params = [{transform_indices = @transform_0, window_bounds = array<i64: 1, 64, 8>}, {transform_indices = @transform_1, window_bounds = array<i64: 1, 64, 8>}, {pipeline_mode = #tpu.pipeline_mode<synchronous>, transform_indices = @transform_2, window_bounds = array<i64: 1, 8>}, {pipeline_mode = #tpu.pipeline_mode<synchronous>, transform_indices = @transform_3, window_bounds = array<i64: 1, 8>}, {pipeline_mode = #tpu.pipeline_mode<synchronous>, transform_indices = @transform_4, window_bounds = array<i64: 1, 8>}, {pipeline_mode = #tpu.pipeline_mode<synchronous>, transform_indices = @transform_5, window_bounds = array<i64: 1, 8>}, {transform_indices = @transform_6, window_bounds = array<i64: 1, 64, 8>}]} {
    %c0 = arith.constant 0 : index
    %c0_0 = arith.constant 0 : index
    %c0_1 = arith.constant 0 : index
    %0 = vector.load %arg2[%c0, %c0_0, %c0_1] : memref<1x64x8xf32, #tpu.memory_space<vmem>>, vector<1x64x8xf32>
    %1 = vector.shape_cast %0 : vector<1x64x8xf32> to vector<64x8xf32>
    %c0_2 = arith.constant 0 : index
    %c0_3 = arith.constant 0 : index
    %2 = vector.load %arg4[%c0_2, %c0_3] : memref<1x8xf32, #tpu.memory_space<vmem>>, vector<1x8xf32>
    %3 = vector.broadcast %2 : vector<1x8xf32> to vector<64x8xf32>
    %4 = arith.mulf %1, %3 : vector<64x8xf32>
    %c0_4 = arith.constant 0 : index
    %c0_5 = arith.constant 0 : index
    %5 = vector.load %arg5[%c0_4, %c0_5] : memref<1x8xf32, #tpu.memory_space<vmem>>, vector<1x8xf32>
    %6 = vector.broadcast %5 : vector<1x8xf32> to vector<64x8xf32>
    %7 = arith.addf %4, %6 : vector<64x8xf32>
    %c0_6 = arith.constant 0 : index
    %c0_7 = arith.constant 0 : index
    %c0_8 = arith.constant 0 : index
    %8 = vector.load %arg3[%c0_6, %c0_7, %c0_8] : memref<1x64x8xf32, #tpu.memory_space<vmem>>, vector<1x64x8xf32>
    %9 = vector.shape_cast %8 : vector<1x64x8xf32> to vector<64x8xf32>
    %c0_9 = arith.constant 0 : index
    %c0_10 = arith.constant 0 : index
    %10 = vector.load %arg6[%c0_9, %c0_10] : memref<1x8xf32, #tpu.memory_space<vmem>>, vector<1x8xf32>
    %11 = vector.broadcast %10 : vector<1x8xf32> to vector<64x8xf32>
    %12 = arith.mulf %9, %11 : vector<64x8xf32>
    %c0_11 = arith.constant 0 : index
    %c0_12 = arith.constant 0 : index
    %13 = vector.load %arg7[%c0_11, %c0_12] : memref<1x8xf32, #tpu.memory_space<vmem>>, vector<1x8xf32>
    %14 = vector.broadcast %13 : vector<1x8xf32> to vector<64x8xf32>
    %15 = arith.addf %12, %14 : vector<64x8xf32>
    %16 = arith.addf %7, %15 : vector<64x8xf32>
    %cst = arith.constant 0.000000e+00 : f32
    %17 = vector.broadcast %cst : f32 to vector<64x8xf32>
    %18 = arith.maximumf %16, %17 : vector<64x8xf32>
    %c0_13 = arith.constant 0 : index
    %c0_14 = arith.constant 0 : index
    %c0_15 = arith.constant 0 : index
    %19 = vector.load %arg8[%c0_13, %c0_14, %c0_15] : memref<1x64x8xf32, #tpu.memory_space<vmem>>, vector<1x64x8xf32>
    %20 = vector.shape_cast %19 : vector<1x64x8xf32> to vector<64x8xf32>
    %21 = vector.shape_cast %18 : vector<64x8xf32> to vector<1x64x8xf32>
    tpu.vector_store %arg8[%c0_13, %c0_14, %c0_15], %21 {strides = array<i32>} : memref<1x64x8xf32, #tpu.memory_space<vmem>>, vector<1x64x8xf32>,
    return
  }
  func.func @transform_0(%arg0: i32, %arg1: i32) -> (i32, i32, i32) {
    %c0_i32 = arith.constant 0 : i32
    %c0_i32_0 = arith.constant 0 : i32
    return %arg0, %arg1, %c0_i32 : i32, i32, i32
  }
  func.func @transform_1(%arg0: i32, %arg1: i32) -> (i32, i32, i32) {
    %c0_i32 = arith.constant 0 : i32
    %c0_i32_0 = arith.constant 0 : i32
    return %arg0, %arg1, %c0_i32 : i32, i32, i32
  }
  func.func @transform_2(%arg0: i32, %arg1: i32) -> (i32, i32) {
    %c0_i32 = arith.constant 0 : i32
    %c0_i32_0 = arith.constant 0 : i32
    %c0_i32_1 = arith.constant 0 : i32
    return %c0_i32, %c0_i32_0 : i32, i32
  }
  func.func @transform_3(%arg0: i32, %arg1: i32) -> (i32, i32) {
    %c0_i32 = arith.constant 0 : i32
    %c0_i32_0 = arith.constant 0 : i32
    %c0_i32_1 = arith.constant 0 : i32
    return %c0_i32, %c0_i32_0 : i32, i32
  }
  func.func @transform_4(%arg0: i32, %arg1: i32) -> (i32, i32) {
    %c0_i32 = arith.constant 0 : i32
    %c0_i32_0 = arith.constant 0 : i32
    %c0_i32_1 = arith.constant 0 : i32
    return %c0_i32, %c0_i32_0 : i32, i32
  }
  func.func @transform_5(%arg0: i32, %arg1: i32) -> (i32, i32) {
    %c0_i32 = arith.constant 0 : i32
    %c0_i32_0 = arith.constant 0 : i32
    %c0_i32_1 = arith.constant 0 : i32
    return %c0_i32, %c0_i32_0 : i32, i32
  }
  func.func @transform_6(%arg0: i32, %arg1: i32) -> (i32, i32, i32) {
    %c0_i32 = arith.constant 0 : i32
    %c0_i32_0 = arith.constant 0 : i32
    return %arg0, %arg1, %c0_i32 : i32, i32, i32
  }
}

</mosaic_0001>

<bundles_post_ra>
// kernel: basic_block_forward.5
= control target key start
LH: loop header
LB: loop body
LE: loop exit
PB: predicated region body
PF: predicated region fallthrough
CT: control target
= control target key end

     0   :  { %s636_s21 = smov 0   ;;  %s638_s22 = smov 0   ;;  %s747_s0 = inlined_call_operand.vmem [shape: f32[2,64,8], index: 0, kind: input, shape index: {}]   ;;  %s748_s1 = inlined_call_operand.vmem [shape: f32[2,64,8], index: 1, kind: input, shape index: {}]   ;;  %s749_s2 = inlined_call_operand.vmem [shape: f32[1,8], index: 2, kind: input, shape index: {}]   ;;  %s750_s3 = inlined_call_operand.vmem [shape: f32[1,8], index: 3, kind: input, shape index: {}]   ;;  %s751_s4 = inlined_call_operand.vmem [shape: f32[1,8], index: 4, kind: input, shape index: {}]   ;;  %s752_s5 = inlined_call_operand.vmem [shape: f32[1,8], index: 5, kind: input, shape index: {}]   ;;  %s753_s6 = inlined_call_operand.vmem [shape: f32[2,64,8], index: 6, kind: output, shape index: {}]  }
   0x1   :  { %s640_s23 = smov 0  }
   0x2 LB: > { %s28_s24 = sadd.s32 1, %s595_s22  ;;  %p537_p0 = scmp.ge.s32.totalorder %s599_s23, 1  ;;  %s599_s23 = sphi %s640_s23, %s16_s23   ;;  %s595_s22 = sphi %s638_s22, %s755_s22   ;;  %s591_s21 = sphi %s636_s21, %s754_s21  }
   0x3   : > { %p30_p1 = scmp.ge.s32.totalorder %s28_s24, 2  ;;  %p250_p2 = scmp.lt.s32.totalorder %s599_s23, 3 }
   0x5   : > { %s757_s24 = smov (%p30_p1, %s28_s24), 0  ;;  %p251_p3 = pnand %p537_p0, %p250_p2 }
   0x6   : > { %p298_p4 = scmp.lt.s32.totalorder (!%p251_p3), %s591_s21, 1  ;;  %v544_v0 = vld [vmem:[%s749_s2] ss:$0 sm:$0xff] (!%p251_p3)  ;;  %vm419_vm0 = vcmask (!%p251_p3), 64512  }
   0x7   : > { %254 = sbr.rel (%p251_p3) target bundleno = 36 (0x24), region = 44  ;;  %v546_v1 = vld [vmem:[%s751_s4] ss:$0 sm:$0xff] (!%p251_p3) }
   0x8   : > { %v677_v2 = vld [vmem:[%s750_s3] ss:$0 sm:$0xff] (!%p251_p3) }
   0x9   : > { %v682_v3 = vld [vmem:[%s752_s5] ss:$0 sm:$0xff] (!%p251_p3) }
   0xe   : > { %s759_s21 = smov (!%p298_p4, %s591_s21), 1 }
   0xf   : > { %s654_s25 = sshll.u32 %s759_s21, 6 }
  0x10   : > { %s666_s8 = scalar_lea.vmem %s747_s0, %s654_s25  ;;  %s672_s11 = scalar_lea.vmem %s748_s1, %s654_s25 }
  0x11   : > { %v327_v4 = vld [vmem:[%s666_s8] sm:$0xff]  ;;  %v328_v6 = vld [vmem:[%s666_s8 + $0x8] sm:$0xff]  ;;  %v329_v11 = vld [vmem:[%s666_s8 + $0x10] sm:$0xff]  ;;  %s707_s18 = scalar_lea.vmem %s753_s6, %s654_s25 }
  0x12   : > { %v365_v5 = vld [vmem:[%s672_s11] sm:$0xff]  ;;  %v342_v7 = vmul.f32 %v544_v0, %v327_v4  ;;  %v343_v9 = vmul.f32 %v544_v0, %v328_v6  ;;  %v366_v10 = vld [vmem:[%s672_s11 + $0x8] sm:$0xff]  ;;  %v367_v12 = vld [vmem:[%s672_s11 + $0x10] sm:$0xff]  ;;  %v344_v14 = vmul.f32 %v544_v0, %v329_v11 }
  0x13   : > { %v380_v8 = vmul.f32 %v546_v1, %v365_v5  ;;  %v381_v13 = vmul.f32 %v546_v1, %v366_v10  ;;  %v382_v15 = vmul.f32 %v546_v1, %v367_v12  ;;  %v330_v16 = vld [vmem:[%s666_s8 + $0x18] sm:$0xff]  ;;  %v331_v18 = vld [vmem:[%s666_s8 + $0x20] sm:$0xff]  ;;  %v332_v24 = vld [vmem:[%s666_s8 + $0x28] sm:$0xff] }
  0x14   : > { %v368_v17 = vld [vmem:[%s672_s11 + $0x18] sm:$0xff]  ;;  %v357_v19 = vadd.f32 %v677_v2, %v342_v7  ;;  %v358_v21 = vadd.f32 %v677_v2, %v343_v9  ;;  %v345_v22 = vmul.f32 %v544_v0, %v330_v16  ;;  %v369_v23 = vld [vmem:[%s672_s11 + $0x20] sm:$0xff]  ;;  %v359_v26 = vadd.f32 %v677_v2, %v344_v14  ;;  %v370_v29 = vld [vmem:[%s672_s11 + $0x28] sm:$0xff] }
  0x15   : > { %v395_v20 = vadd.f32 %v682_v3, %v380_v8  ;;  %v396_v25 = vadd.f32 %v682_v3, %v381_v13  ;;  %v397_v27 = vadd.f32 %v682_v3, %v382_v15  ;;  %v383_v28 = vmul.f32 %v546_v1, %v368_v17  ;;  %v333_v38 = vld [vmem:[%s666_s8 + $0x30] sm:$0xff]  ;;  %v334_v44 = vld [vmem:[%s666_s8 + $0x38] sm:$0xff] }
  0x16   : > { %v360_v31 = vadd.f32 %v677_v2, %v345_v22  ;;  %v346_v32 = vmul.f32 %v544_v0, %v331_v18  ;;  %v384_v33 = vmul.f32 %v546_v1, %v369_v23  ;;  %v347_v37 = vmul.f32 %v544_v0, %v332_v24  ;;  %v371_v39 = vld [vmem:[%s672_s11 + $0x30] sm:$0xff]  ;;  %v372_v45 = vld [vmem:[%s672_s11 + $0x38] sm:$0xff] }
  0x17   : > { %v403_v30 = vadd.f32 %v395_v20, %v357_v19  ;;  %v404_v34 = vadd.f32 %v396_v25, %v358_v21  ;;  %v405_v35 = vadd.f32 %v397_v27, %v359_v26  ;;  %v398_v36 = vadd.f32 %v682_v3, %v383_v28 }
  0x18   : > { %v361_v41 = vadd.f32 %v677_v2, %v346_v32  ;;  %v399_v42 = vadd.f32 %v682_v3, %v384_v33  ;;  %v385_v43 = vmul.f32 %v546_v1, %v370_v29  ;;  %v362_v49 = vadd.f32 %v677_v2, %v347_v37 }
  0x19   : > { %v411_v40 = vmax.f32 %v403_v30, 0.0  ;;  %v412_v46 = vmax.f32 %v404_v34, 0.0  ;;  %v413_v47 = vmax.f32 %v405_v35, 0.0  ;;  %v406_v48 = vadd.f32 %v398_v36, %v360_v31 }
  0x1a   : > { %v407_v50 = vadd.f32 %v399_v42, %v361_v41  ;;  %v400_v51 = vadd.f32 %v682_v3, %v385_v43  ;;  %v348_v52 = vmul.f32 %v544_v0, %v333_v38  ;;  %v386_v53 = vmul.f32 %v546_v1, %v371_v39 }
  0x1b   : > { %420 = vst.msk [vmem:[%s707_s18] sm:$0xff] %vm419_vm0, %v411_v40  ;;  %421 = vst.msk [vmem:[%s707_s18 + $0x8] sm:$0xff] %vm419_vm0, %v412_v46  ;;  %v414_v54 = vmax.f32 %v406_v48, 0.0  ;;  %v349_v55 = vmul.f32 %v544_v0, %v334_v44  ;;  %v387_v56 = vmul.f32 %v546_v1, %v372_v45 }
  0x1c   : > { %422 = vst.msk [vmem:[%s707_s18 + $0x10] sm:$0xff] %vm419_vm0, %v413_v47  ;;  %v415_v57 = vmax.f32 %v407_v50, 0.0  ;;  %v408_v58 = vadd.f32 %v400_v51, %v362_v49  ;;  %v363_v59 = vadd.f32 %v677_v2, %v348_v52  ;;  %v401_v60 = vadd.f32 %v682_v3, %v386_v53 }
  0x1d   : > { %423 = vst.msk [vmem:[%s707_s18 + $0x18] sm:$0xff] %vm419_vm0, %v414_v54  ;;  %v364_v61 = vadd.f32 %v677_v2, %v349_v55  ;;  %v402_v62 = vadd.f32 %v682_v3, %v387_v56 }
  0x1e   : > { %424 = vst.msk [vmem:[%s707_s18 + $0x20] sm:$0xff] %vm419_vm0, %v415_v57  ;;  %v416_v63 = vmax.f32 %v408_v58, 0.0  ;;  %v409_v4 = vadd.f32 %v401_v60, %v363_v59 }
  0x1f   : > { %v410_v0 = vadd.f32 %v402_v62, %v364_v61 }
  0x20   : > { %425 = vst.msk [vmem:[%s707_s18 + $0x28] sm:$0xff] %vm419_vm0, %v416_v63  ;;  %v417_v1 = vmax.f32 %v409_v4, 0.0 }
  0x21   : > { %v418_v5 = vmax.f32 %v410_v0, 0.0 }
  0x22   : > { %426 = vst.msk [vmem:[%s707_s18 + $0x30] sm:$0xff] %vm419_vm0, %v417_v1 }
  0x23   : > { %427 = vst.msk [vmem:[%s707_s18 + $0x38] sm:$0xff] %vm419_vm0, %v418_v5 }
  0x24 PF: > { %s16_s23 = sadd.s32 1, %s599_s23   ;;  %s754_s21 = smov %s595_s22 }
  0x25   : > { %p13_p5 = scmp.ge.s32.totalorder %s16_s23, 4   ;;  %s755_s22 = smov %s757_s24 }
  0x27   :  { %15 = sbr.rel (!%p13_p5) target bundleno = 2 (0x2), region = 77 }

// kernel: basic_block_forward.4
= control target key start
LH: loop header
LB: loop body
LE: loop exit
PB: predicated region body
PF: predicated region fallthrough
CT: control target
= control target key end

     0   :  { %s1221_s21 = smov 0   ;;  %s1682_s0 = inlined_call_operand.vmem [shape: f32[2,10,10,8], index: 0, kind: input, shape index: {}]   ;;  %s1683_s1 = inlined_call_operand.vmem [shape: f32[1,8], index: 1, kind: input, shape index: {}]   ;;  %s1684_s2 = inlined_call_operand.vmem [shape: f32[1,8], index: 2, kind: input, shape index: {}]   ;;  %s1685_s3 = inlined_call_operand.vmem [shape: f32[72,8], index: 3, kind: input, shape index: {}]   ;;  %s1686_s4 = inlined_call_operand.vmem [shape: f32[2,64,8], index: 4, kind: output, shape index: {0}]   ;;  %s1687_s5 = inlined_call_operand.vmem [shape: f32[2,1,8], index: 5, kind: output, shape index: {1}]   ;;  %s1688_s6 = inlined_call_operand.vmem [shape: f32[2,1,8], index: 6, kind: output, shape index: {2}]  }
   0x1 LB: > { %s1057_s22 = sadd.s32 4294967295, %s1175_s21   ;;  %p1061_p0 = scmp.ge.s32.totalorder %s1175_s21, 1  ;;  %s1175_s21 = sphi %s1221_s21, %s17_s21  }
   0x2   : > { %p217_p1 = scmp.lt.s32.totalorder %s1175_s21, 3 }
   0x4   : > { %p218_p2 = pnand %p1061_p0, %p217_p1 }
   0x5   : > { %v363_v0 = vlaneseq (!%p218_p2)  ;;  %v1177_v1 = vmov (!%p218_p2), 0.0   ;;  %p253_p3 = scmp.lt.s32.totalorder (!%p218_p2), %s1057_s22, 1  ;;  %s1178_s23 = smov (!%p218_p2), 16   ;;  %v1247_v5 = vld [vmem:[%s1683_s1] ss:$0 sm:$0xff] (!%p218_p2)  ;;  %vm471_vm2 = vcmask (!%p218_p2), 1045504  }
   0x6   : > { %221 = sbr.rel (%p218_p2) target bundleno = 495 (0x1ef), region = 36  ;;  %v1230_v2 = vrot.slane (!%p218_p2), %v1177_v1, 2  ;;  %v1233_v3 = vrot.slane (!%p218_p2), %v1177_v1, 1  ;;  %s1179_s24 = smov (!%p218_p2), 8   ;;  %v1257_v6 = vld [vmem:[%s1684_s2] ss:$0 sm:$0xff] (!%p218_p2) }
   0x7   : > { %v1241_v4 = vshrl.u32 (!%p218_p2), %v363_v0, 7  ;;  %vm422_vm3 = vcmask (!%p218_p2), 1046528   ;;  %s1180_s9 = smov (!%p218_p2), 24   ;;  %s1181_s10 = smov (!%p218_p2), 32   ;;  %vm680_vm4 = vcmask (!%p218_p2), 64512   ;;  %vm689_vm5 = vcmask (!%p218_p2), 130048  }
   0x8   : > { %496 = vrot.lane.b32.xlu1 (!%p218_p2), %v1230_v2, %s1178_s23  ;;  %447 = vrot.lane.b32.xlu0 (!%p218_p2), %v1233_v3, %s1179_s24  ;;  %s1182_s11 = smov (!%p218_p2), 40   ;;  %s1183_s20 = smov (!%p218_p2), 48   ;;  %vm698_vm6 = vcmask (!%p218_p2), 195584   ;;  %vm707_vm7 = vcmask (!%p218_p2), 261120   ;;  %vm716_vm8 = vcmask (!%p218_p2), 326656   ;;  %vm725_vm9 = vcmask (!%p218_p2), 392192  }
   0x9   : > { %v1263_v10 = vadd.s32 (!%p218_p2), 8, %v1241_v4  ;;  %vm366_vm0 = vcmp.ge.s32.totalorder (!%p218_p2), %v1241_v4, 1  ;;  %s1184_s12 = smov (!%p218_p2), 56   ;;  %s1185_s15 = smov (!%p218_p2), 64   ;;  %vm734_vm10 = vcmask (!%p218_p2), 457728   ;;  %vm743_vm11 = vcmask (!%p218_p2), 523264  }
   0xa   : > { %vm761_vm12 = vcmask (!%p218_p2), 588800   ;;  %vm920_vm13 = vcmask (!%p218_p2), 57344  }
   0xb   : > { %vm373_vm1 = vcmp.lt.s32.totalorder (!%p218_p2), %v1263_v10, 9 }
   0xd   : > { %s1690_s22 = smov (!%p253_p3, %s1057_s22), 1 }
   0xe   : > { %s1151_s25 = smul.u32 160, %s1690_s22  ;;  %s265_s17 = scalar_lea.vmem %s1687_s5, %s1690_s22 }
  0x10   : > { %s1252_s30 = scalar_lea.vmem %s1682_s0, %s1151_s25 }
  0x11   : > { %v273_v7 = vld [vmem:[%s1252_s30 + $0x20] sm:$0xff]  ;;  %v271_v8 = vld [vmem:[%s1252_s30 + $0x10] sm:$0xff]  ;;  %v272_v9 = vld [vmem:[%s1252_s30 + $0x18] sm:$0x3] }
  0x12   : > { %v301_v11 = vmul.f32 %v1247_v5, %v273_v7  ;;  %v299_v12 = vmul.f32 %v1247_v5, %v271_v8  ;;  %v300_v13 = vmul.f32 %v1247_v5, %v272_v9  ;;  %v274_v14 = vld [vmem:[%s1252_s30 + $0x28] sm:$0x3]  ;;  %v275_v15 = vld [vmem:[%s1252_s30 + $0x30] sm:$0xff]  ;;  %v276_v16 = vld [vmem:[%s1252_s30 + $0x38] sm:$0x3] }
  0x13   : > { %v302_v17 = vmul.f32 %v1247_v5, %v274_v14  ;;  %v303_v18 = vmul.f32 %v1247_v5, %v275_v15  ;;  %v304_v19 = vmul.f32 %v1247_v5, %v276_v16  ;;  %v281_v44 = vld [vmem:[%s1252_s30 + $0x60] sm:$0xff]  ;;  %v282_v45 = vld [vmem:[%s1252_s30 + $0x68] sm:$0x3]  ;;  %v283_v46 = vld [vmem:[%s1252_s30 + $0x70] sm:$0xff] }
  0x14   : > { %v327_v20 = vadd.f32 %v1257_v6, %v301_v11  ;;  %v325_v21 = vadd.f32 %v1257_v6, %v299_v12  ;;  %v326_v22 = vadd.f32 %v1257_v6, %v300_v13  ;;  %v309_v50 = vmul.f32 %v1247_v5, %v281_v44  ;;  %v284_v51 = vld [vmem:[%s1252_s30 + $0x78] sm:$0x3]  ;;  %v277_v59 = vld [vmem:[%s1252_s30 + $0x40] sm:$0xff]  ;;  %v278_v15 = vld [vmem:[%s1252_s30 + $0x48] sm:$0x3] }
  0x15   : > { %v328_v23 = vadd.f32 %v1257_v6, %v302_v17  ;;  %v329_v27 = vadd.f32 %v1257_v6, %v303_v18  ;;  %v330_v29 = vadd.f32 %v1257_v6, %v304_v19  ;;  %v310_v52 = vmul.f32 %v1247_v5, %v282_v45  ;;  %v285_v12 = vld [vmem:[%s1252_s30 + $0x80] sm:$0xff] }
  0x16   : > { %v347_v24 = vmax.f32 %v327_v20, 0.0  ;;  %v345_v25 = vmax.f32 %v325_v21, 0.0  ;;  %v346_v26 = vmax.f32 %v326_v22, 0.0  ;;  %v311_v53 = vmul.f32 %v1247_v5, %v283_v46  ;;  %v286_v22 = vld [vmem:[%s1252_s30 + $0x88] sm:$0x3] }
  0x17   : > { %v348_v28 = vmax.f32 %v328_v23, 0.0  ;;  %v349_v39 = vmax.f32 %v329_v27, 0.0  ;;  %v350_v43 = vmax.f32 %v330_v29, 0.0  ;;  %v335_v57 = vadd.f32 %v1257_v6, %v309_v50  ;;  %v752_v27 = vld [vmem:[%s1685_s3] sm:$0xff] }
  0x18   : > { %v1284_v30 = vsel %vm366_vm0, %v347_v24, 0.0  ;;  %v1288_v31 = vsel %vm366_vm0, %v345_v25, 0.0  ;;  %v389_v32 = vsel %vm373_vm1, %v346_v26, 0.0  ;;  %v336_v60 = vadd.f32 %v1257_v6, %v310_v52  ;;  %v757_v52 = vld [vmem:[%s1685_s3 + $0x28] sm:$0xff] }
  0x19   : > { %523 = vrot.lane.b32.xlu1 %v1284_v30, %s1180_s9  ;;  %521 = vrot.lane.b32.xlu0 %v1288_v31, %s1180_s9  ;;  %v475_v33 = vrot.slane %v1288_v31, 2  ;;  %v476_v34 = vrot.slane %v389_v32, 2  ;;  %v426_v35 = vrot.slane %v1288_v31, 1  ;;  %v427_v36 = vrot.slane %v389_v32, 1 }
  0x1a   : > { %v391_v37 = vsel %vm373_vm1, %v348_v28, 0.0  ;;  %v429_v38 = vrot.slane %v1284_v30, 1  ;;  %v1313_v48 = vsel %vm366_vm0, %v349_v39, 0.0  ;;  %v1317_v49 = vsel %vm373_vm1, %v350_v43, 0.0  ;;  %v753_v28 = vld [vmem:[%s1685_s3 + $0x8] sm:$0xff]  ;;  %v754_v39 = vld [vmem:[%s1685_s3 + $0x10] sm:$0xff] }
  0x1b   : > { %v477_v40 = vsel %vm471_vm2, %v475_v33, %v476_v34  ;;  %v428_v41 = vsel %vm422_vm3, %v426_v35, %v427_v36  ;;  %v430_v42 = vrot.slane %v391_v37, 1  ;;  %v478_v54 = vrot.slane %v1284_v30, 2 }
  0x1c   : > { %v479_v55 = vrot.slane %v391_v37, 2  ;;  %v432_v56 = vrot.slane %v1313_v48, 1  ;;  %v433_v58 = vrot.slane %v1317_v49, 1  ;;  %v312_v61 = vmul.f32 %v1247_v5, %v284_v51  ;;  %v756_v51 = vld [vmem:[%s1685_s3 + $0x20] sm:$0xff] }
  0x1d   : > { %498 = vrot.lane.b32.xlu1 %v477_v40, %s1178_s23  ;;  %449 = vrot.lane.b32.xlu0 %v428_v41, %s1179_s24  ;;  %v1309_v47 = vsel %vm422_vm3, %v429_v38, %v430_v42  ;;  %v337_v62 = vadd.f32 %v1257_v6, %v311_v53  ;;  %v355_v63 = vmax.f32 %v335_v57, 0.0  ;;  %v356_v0 = vmax.f32 %v336_v60, 0.0 }
  0x1e   : > { %v338_v7 = vadd.f32 %v1257_v6, %v312_v61  ;;  %v305_v9 = vmul.f32 %v1247_v5, %v277_v59  ;;  %v1345_v13 = vsel %vm471_vm2, %v478_v54, %v479_v55  ;;  %v1348_v14 = vsel %vm422_vm3, %v432_v56, %v433_v58  ;;  %v279_v58 = vld [vmem:[%s1252_s30 + $0x50] sm:$0xff]  ;;  %v280_v59 = vld [vmem:[%s1252_s30 + $0x58] sm:$0x3] }
  0x1f   : > { %v357_v8 = vmax.f32 %v337_v62, 0.0  ;;  %v1341_v11 = vsel %vm366_vm0, %v355_v63, 0.0  ;;  %v399_v16 = vsel %vm373_vm1, %v356_v0, 0.0  ;;  %v481_v23 = vrot.slane %v1313_v48, 2  ;;  %v758_v0 = vld [vmem:[%s1685_s3 + $0x30] sm:$0xff] }
  0x20   : > { %v441_v17 = vrot.slane %v1341_v11, 1  ;;  %v442_v18 = vrot.slane %v399_v16, 1  ;;  %v490_v19 = vrot.slane %v1341_v11, 2  ;;  %v491_v20 = vrot.slane %v399_v16, 2 }
  0x21   : > { %451 = vrot.lane.b32.xlu1 %v1309_v47, %s1179_s24  ;;  %549 = vrot.lane.b32.xlu0 %v428_v41, %s1181_s10  ;;  %v358_v21 = vmax.f32 %v338_v7, 0.0  ;;  %v482_v24 = vrot.slane %v1317_v49, 2  ;;  %v1360_v25 = vsel %vm366_vm0, %v357_v8, 0.0  ;;  %v313_v26 = vmul.f32 %v1247_v5, %v285_v12  ;;  %v759_v7 = vld [vmem:[%s1685_s3 + $0x38] sm:$0xff] }
  0x22   : > { %v1374_v29 = vsel %vm422_vm3, %v441_v17, %v442_v18  ;;  %v1377_v32 = vsel %vm471_vm2, %v490_v19, %v491_v20  ;;  %v444_v34 = vrot.slane %v1360_v25, 1  ;;  %v493_v36 = vrot.slane %v1360_v25, 2 }
  0x23   : > { %v401_v33 = vsel %vm373_vm1, %v358_v21, 0.0  ;;  %v339_v38 = vadd.f32 %v1257_v6, %v313_v26  ;;  %v306_v41 = vmul.f32 %v1247_v5, %v278_v15  ;;  %v314_v42 = vmul.f32 %v1247_v5, %v286_v22 }
  0x24   : > { %v445_v35 = vrot.slane %v401_v33, 1  ;;  %v494_v37 = vrot.slane %v401_v33, 2  ;;  %v1125_v43 = vpack.c.bf16 %v753_v28, %v752_v27  ;;  %v1410_v53 = vsel %vm471_vm2, %v481_v23, %v482_v24 }
  0x25   : > { %576 = vrot.lane.b32.xlu1 %v477_v40, %s1182_s11  ;;  %551 = vrot.lane.b32.xlu0 %v1309_v47, %s1181_s10  ;;  %v755_v40 = vld [vmem:[%s1685_s3 + $0x18] sm:$0xff]  ;;  %v359_v46 = vmax.f32 %v339_v38, 0.0  ;;  %v340_v49 = vadd.f32 %v1257_v6, %v314_v42  ;;  %v331_v54 = vadd.f32 %v1257_v6, %v305_v9  ;;  %v332_v56 = vadd.f32 %v1257_v6, %v306_v41 }
  0x26   : > { %v1393_v44 = vsel %vm422_vm3, %v444_v34, %v445_v35  ;;  %v1396_v45 = vsel %vm471_vm2, %v493_v36, %v494_v37  ;;  %v1129_v50 = vpack.c.bf16 %v755_v40, %v754_v39  ;;  %1126 = vmatprep.subr.bf16.mxu0 %v1125_v43  ;;  %1141 = vmatprep.subr.bf16.mxu1 %v1125_v43 }
  0x27   : > { %v1415_v55 = vsel %vm366_vm0, %v359_v46, 0.0  ;;  %v360_v57 = vmax.f32 %v340_v49, 0.0  ;;  %1128 = vmatpush3.bf16.msra.mxu0 %v1125_v43  ;;  %1146 = vmatpush3.bf16.msra.mxu1 %v1125_v43  ;;  %v1133_v62 = vpack.c.bf16 %v757_v52, %v756_v51  ;;  %v351_v8 = vmax.f32 %v331_v54, 0.0 }
  0x28   : > { %v546_v60 = vrot.slane %v1415_v55, 1  ;;  %v573_v61 = vrot.slane %v1415_v55, 2  ;;  %1130 = vmatprep.subr.bf16.mxu0 %v1129_v50  ;;  %1142 = vmatprep.subr.bf16.mxu1 %v1129_v50  ;;  %v352_v15 = vmax.f32 %v332_v56, 0.0  ;;  %v307_v16 = vmul.f32 %v1247_v5, %v279_v58 }
  0x29   : > { %500 = vrot.lane.b32.xlu1 %v1345_v13, %s1178_s23  ;;  %453 = vrot.lane.b32.xlu0 %v1348_v14, %s1179_s24  ;;  %v403_v63 = vsel %vm373_vm1, %v360_v57, 0.0  ;;  %v308_v17 = vmul.f32 %v1247_v5, %v280_v59  ;;  %v1137_v20 = vpack.c.bf16 %v759_v7, %v758_v0  ;;  %v1448_v5 = vsel %vm366_vm0, %v351_v8, 0.0 }
  0x2a   : > { %v547_v9 = vrot.slane %v403_v63, 1  ;;  %v574_v12 = vrot.slane %v403_v63, 2  ;;  %v395_v21 = vsel %vm373_vm1, %v352_v15, 0.0  ;;  %v333_v22 = vadd.f32 %v1257_v6, %v307_v16 }
  0x2b   : > { %1132 = vmatpush3.bf16.msra.mxu0 %v1129_v50  ;;  %1147 = vmatpush3.bf16.msra.mxu1 %v1129_v50  ;;  %v334_v23 = vadd.f32 %v1257_v6, %v308_v17  ;;  %v435_v24 = vrot.slane %v1448_v5, 1  ;;  %v436_v26 = vrot.slane %v395_v21, 1  ;;  %v485_v35 = vrot.slane %v395_v21, 2 }
  0x2c   : > { %v1437_v18 = vsel %vm422_vm3, %v546_v60, %v547_v9  ;;  %v1440_v19 = vsel %vm471_vm2, %v573_v61, %v574_v12  ;;  %1134 = vmatprep.subr.bf16.mxu0 %v1133_v62  ;;  %1143 = vmatprep.subr.bf16.mxu1 %v1133_v62  ;;  %v353_v27 = vmax.f32 %v333_v22, 0.0 }
  0x2d   : > { %601 = vrot.lane.b32.xlu1 %v1284_v30, %s1183_s20  ;;  %578 = vrot.lane.b32.xlu0 %v1345_v13, %s1182_s11  ;;  %v354_v28 = vmax.f32 %v334_v23, 0.0  ;;  %v437_v6 = vsel %vm422_vm3, %v435_v24, %v436_v26 }
  0x2e   : > { %v1469_v33 = vsel %vm366_vm0, %v353_v27, 0.0 }
  0x2f   : > { %1136 = vmatpush3.bf16.msra.mxu0 %v1133_v62  ;;  %1148 = vmatpush3.bf16.msra.mxu1 %v1133_v62  ;;  %v397_v34 = vsel %vm373_vm1, %v354_v28, 0.0  ;;  %v487_v37 = vrot.slane %v1469_v33, 2 }
  0x30   : > { %1138 = vmatprep.subr.bf16.mxu0 %v1137_v20  ;;  %1144 = vmatprep.subr.bf16.mxu1 %v1137_v20  ;;  %v439_v36 = vrot.slane %v397_v34, 1  ;;  %v488_v38 = vrot.slane %v397_v34, 2 }
  0x31   : > { %525 = vrot.lane.b32.xlu1 %v1313_v48, %s1180_s9  ;;  %502 = vrot.lane.b32.xlu0 %v1410_v53, %s1178_s23 }
  0x32   : > { %v489_v39 = vsel %vm471_vm2, %v487_v37, %v488_v38 }
  0x33   : > { %1140 = vmatpush3.bf16.msra.mxu0 %v1137_v20  ;;  %1149 = vmatpush3.bf16.msra.mxu1 %v1137_v20 }
  0x35   : > { %629 = vrot.lane.b32.xlu1 %v1309_v47, %s1184_s12  ;;  %603 = vrot.lane.b32.xlu0 %v1313_v48, %s1183_s20  ;;  %v760_v47 = vld [vmem:[%s1685_s3 + $0x40] sm:$0xff] }
  0x36   : > { %1111 = vmatprep.subr.mxu0 %v760_v47  ;;  %1145 = vmatprep.subr.mxu1 %v760_v47 }
  0x37   : > { %1112 = vmatpush3.msra.mxu0 %v760_v47  ;;  %1150 = vmatpush3.msra.mxu1 %v760_v47 }
  0x39   : > { %553 = vrot.lane.b32.xlu1 %v1348_v14, %s1181_s10  ;;  %527 = vrot.lane.b32.xlu0 %v1448_v5, %s1180_s9 }
  0x3d   : > { %656 = vrot.lane.b32.xlu1 %v1345_v13, %s1185_s15  ;;  %631 = vrot.lane.b32.xlu0 %v1348_v14, %s1184_s12  ;;  %v484_v13 = vrot.slane %v1448_v5, 2  ;;  %v438_v14 = vrot.slane %v1469_v33, 1 }
  0x3f   : > { %v486_v4 = vsel %vm471_vm2, %v484_v13, %v485_v35  ;;  %v440_v10 = vsel %vm422_vm3, %v438_v14, %v439_v36 }
  0x41   : > { %555 = vrot.lane.b32.xlu1 %v437_v6, %s1181_s10  ;;  %455 = vrot.lane.b32.xlu0 %v437_v6, %s1179_s24 }
  0x45   : > { %658 = vrot.lane.b32.xlu1 %v1410_v53, %s1185_s15  ;;  %580 = vrot.lane.b32.xlu0 %v1410_v53, %s1182_s11 }
  0x49   : > { %504 = vrot.lane.b32.xlu1 %v486_v4, %s1178_s23  ;;  %457 = vrot.lane.b32.xlu0 %v440_v10, %s1179_s24 }
  0x4d   : > { %605 = vrot.lane.b32.xlu1 %v1448_v5, %s1183_s20  ;;  %582 = vrot.lane.b32.xlu0 %v486_v4, %s1182_s11 }
  0x51   : > { %529 = vrot.lane.b32.xlu1 %v1469_v33, %s1180_s9  ;;  %506 = vrot.lane.b32.xlu0 %v489_v39, %s1178_s23 }
  0x55   : > { %633 = vrot.lane.b32.xlu1 %v437_v6, %s1184_s12  ;;  %607 = vrot.lane.b32.xlu0 %v1469_v33, %s1183_s20 }
  0x59   : > { %557 = vrot.lane.b32.xlu1 %v440_v10, %s1181_s10  ;;  %531 = vrot.lane.b32.xlu0 %v1341_v11, %s1180_s9 }
  0x5d   : > { %660 = vrot.lane.b32.xlu1 %v486_v4, %s1185_s15  ;;  %635 = vrot.lane.b32.xlu0 %v440_v10, %s1184_s12 }
  0x61   : > { %559 = vrot.lane.b32.xlu1 %v1374_v29, %s1181_s10  ;;  %459 = vrot.lane.b32.xlu0 %v1374_v29, %s1179_s24 }
  0x65   : > { %662 = vrot.lane.b32.xlu1 %v489_v39, %s1185_s15  ;;  %584 = vrot.lane.b32.xlu0 %v489_v39, %s1182_s11 }
  0x69   : > { %508 = vrot.lane.b32.xlu1 %v1377_v32, %s1178_s23  ;;  %461 = vrot.lane.b32.xlu0 %v1393_v44, %s1179_s24 }
  0x6d   : > { %609 = vrot.lane.b32.xlu1 %v1341_v11, %s1183_s20  ;;  %586 = vrot.lane.b32.xlu0 %v1377_v32, %s1182_s11 }
  0x71   : > { %533 = vrot.lane.b32.xlu1 %v1360_v25, %s1180_s9  ;;  %510 = vrot.lane.b32.xlu0 %v1396_v45, %s1178_s23  ;;  %s1077_s23 = sshll.u32 %s1690_s22, 6 }
  0x75   : > { %637 = vrot.lane.b32.xlu1 %v1374_v29, %s1184_s12  ;;  %611 = vrot.lane.b32.xlu0 %v1360_v25, %s1183_s20 }
  0x79   : > { %561 = vrot.lane.b32.xlu1 %v1393_v44, %s1181_s10  ;;  %535 = vrot.lane.b32.xlu0 %v1415_v55, %s1180_s9 }
  0x7a   : > { %v497_v29 = vpop.permute.xlu1 %496  ;;  %v448_v40 = vpop.permute.xlu0 %447 }
  0x7b   : > { %v681_v54 = vsel %vm680_vm4, 0.0, %v448_v40 }
  0x7c   : > { %v690_v56 = vsel %vm689_vm5, %v681_v54, %v497_v29 }
  0x7d   : > { %664 = vrot.lane.b32.xlu1 %v1377_v32, %s1185_s15  ;;  %639 = vrot.lane.b32.xlu0 %v1393_v44, %s1184_s12 }
  0x81   : > { %588 = vrot.lane.b32.xlu1 %v1396_v45, %s1182_s11  ;;  %563 = vrot.lane.b32.xlu0 %v1437_v18, %s1181_s10  ;;  %s1637_s10 = scalar_lea.vmem %s1686_s4, %s1077_s23 }
  0x85   : > { %590 = vrot.lane.b32.xlu1 %v1440_v19, %s1182_s11  ;;  %666 = vrot.lane.b32.xlu0 %v1396_v45, %s1185_s15 }
  0x89   : > { %615 = vrot.lane.b32.xlu1 %v1177_v1, %s1183_s20  ;;  %613 = vrot.lane.b32.xlu0 %v1415_v55, %s1183_s20  ;;  %s268_s20 = scalar_lea.vmem %s1688_s6, %s1690_s22 }
  0x8b   : > { %v524_v32 = vpop.permute.xlu1 %523  ;;  %v522_v41 = vpop.permute.xlu0 %521 }
  0x8c   : > { %v699_v57 = vsel %vm698_vm6, %v690_v56, %v522_v41 }
  0x8d   : > { %643 = vrot.lane.b32.xlu1 %v1233_v3, %s1184_s12  ;;  %641 = vrot.lane.b32.xlu0 %v1437_v18, %s1184_s12 }
  0x8f   : > { %v499_v42 = vpop.permute.xlu1 %498  ;;  %v450_v43 = vpop.permute.xlu0 %449 }
  0x90   : > { %v682_v61 = vsel %vm680_vm4, %v1288_v31, %v450_v43 }
  0x91   : > { %670 = vrot.lane.b32.xlu1 %v1230_v2, %s1185_s15  ;;  %668 = vrot.lane.b32.xlu0 %v1440_v19, %s1185_s15  ;;  %v691_v9 = vsel %vm689_vm5, %v682_v61, %v499_v42 }
  0x92   : > { %v700_v15 = vsel %vm698_vm6, %v691_v9, %v524_v32 }
  0x93   : > { %v452_v1 = vpop.permute.xlu1 %451  ;;  %v550_v44 = vpop.permute.xlu0 %549 }
  0x94   : > { %v708_v60 = vsel %vm707_vm7, %v699_v57, %v550_v44  ;;  %v683_v35 = vsel %vm680_vm4, %v1284_v30, %v452_v1 }
  0x97   : > { %v577_v45 = vpop.permute.xlu1 %576  ;;  %v552_v46 = vpop.permute.xlu0 %551 }
  0x98   : > { %v717_v62 = vsel %vm716_vm8, %v708_v60, %v577_v45  ;;  %v709_v17 = vsel %vm707_vm7, %v700_v15, %v552_v46 }
  0x9b   : > { %v501_v49 = vpop.permute.xlu1 %500  ;;  %v1551_v50 = vpop.permute.xlu0 %453 }
  0x9c   : > { %v692_v14 = vsel %vm689_vm5, %v683_v35, %v501_v49  ;;  %v684_v30 = vsel %vm680_vm4, %v1313_v48, %v1551_v50 }
  0x9f   : > { %v602_v51 = vpop.permute.xlu1 %601  ;;  %v579_v3 = vpop.permute.xlu0 %578 }
  0xa0   : > { %v726_v63 = vsel %vm725_vm9, %v717_v62, %v602_v51  ;;  %v718_v18 = vsel %vm716_vm8, %v709_v17, %v579_v3 }
  0xa3   : > { %v526_v52 = vpop.permute.xlu1 %525  ;;  %v503_v53 = vpop.permute.xlu0 %502 }
  0xa4   : > { %v701_v36 = vsel %vm698_vm6, %v692_v14, %v526_v52  ;;  %v693_v42 = vsel %vm689_vm5, %v684_v30, %v503_v53 }
  0xa7   : > { %v630_v55 = vpop.permute.xlu1 %629  ;;  %v604_v2 = vpop.permute.xlu0 %603 }
  0xa8   : > { %v735_v0 = vsel %vm734_vm10, %v726_v63, %v630_v55  ;;  %v727_v19 = vsel %vm725_vm9, %v718_v18, %v604_v2 }
  0xab   : > { %v554_v58 = vpop.permute.xlu1 %553  ;;  %v528_v59 = vpop.permute.xlu0 %527 }
  0xac   : > { %v710_v37 = vsel %vm707_vm7, %v701_v36, %v554_v58  ;;  %v702_v43 = vsel %vm698_vm6, %v693_v42, %v528_v59 }
  0xaf   : > { %v657_v7 = vpop.permute.xlu1 %656  ;;  %v632_v8 = vpop.permute.xlu0 %631 }
  0xb0   : > { %v744_v12 = vsel %vm743_vm11, %v735_v0, %v657_v7  ;;  %v736_v20 = vsel %vm734_vm10, %v727_v19, %v632_v8 }
  0xb1   : > { %1113 = vmatprep.mubr.msk.f32.mxu0 %vm761_vm12, %v744_v12 }
  0xb3   : > { %v556_v16 = vpop.permute.xlu1 %555  ;;  %v456_v31 = vpop.permute.xlu0 %455 }
  0xb4   : > { %v711_v45 = vsel %vm707_vm7, %v702_v43, %v556_v16  ;;  %v685_v59 = vsel %vm680_vm4, %v1448_v5, %v456_v31 }
  0xb7   : > { %v659_v21 = vpop.permute.xlu1 %658  ;;  %v581_v22 = vpop.permute.xlu0 %580 }
  0xb8   : > { %v745_v23 = vsel %vm743_vm11, %v736_v20, %v659_v21  ;;  %v719_v38 = vsel %vm716_vm8, %v710_v37, %v581_v22 }
  0xb9   : > { %1114 = vmatmul.mubr.msk.f32.vlgmr.msra.gmra.mrb[0].mxu0 %vm761_vm12, %v745_v23 }
  0xbb   : > { %v505_v47 = vpop.permute.xlu1 %504  ;;  %v458_v24 = vpop.permute.xlu0 %457 }
  0xbc   : > { %v694_v60 = vsel %vm689_vm5, %v685_v59, %v505_v47  ;;  %v686_v5 = vsel %vm680_vm4, %v1469_v33, %v458_v24 }
  0xbf   : > { %v606_v26 = vpop.permute.xlu1 %605  ;;  %v583_v27 = vpop.permute.xlu0 %582 }
  0xc0   : > { %v728_v39 = vsel %vm725_vm9, %v719_v38, %v606_v26  ;;  %v720_v46 = vsel %vm716_vm8, %v711_v45, %v583_v27 }
  0xc3   : > { %v530_v28 = vpop.permute.xlu1 %529  ;;  %v507_v6 = vpop.permute.xlu0 %506 }
  0xc4   : > { %v703_v61 = vsel %vm698_vm6, %v694_v60, %v530_v28  ;;  %v695_v31 = vsel %vm689_vm5, %v686_v5, %v507_v6 }
  0xc7   : > { %v634_v34 = vpop.permute.xlu1 %633  ;;  %v608_v13 = vpop.permute.xlu0 %607 }
  0xc8   : > { %v737_v29 = vsel %vm734_vm10, %v728_v39, %v634_v34  ;;  %v729_v49 = vsel %vm725_vm9, %v720_v46, %v608_v13 }
  0xcb   : > { %v558_v4 = vpop.permute.xlu1 %557  ;;  %v532_v10 = vpop.permute.xlu0 %531 }
  0xcc   : > { %v712_v0 = vsel %vm707_vm7, %v703_v61, %v558_v4  ;;  %v704_v17 = vsel %vm698_vm6, %v695_v31, %v532_v10 }
  0xcf   : > { %v661_v40 = vpop.permute.xlu1 %660  ;;  %v636_v32 = vpop.permute.xlu0 %635 }
  0xd0   : > { %v746_v41 = vsel %vm743_vm11, %v737_v29, %v661_v40  ;;  %v738_v51 = vsel %vm734_vm10, %v729_v49, %v636_v32 }
  0xd1   : > { %1116 = vmatprep.mubr.msk.f32.mxu0 %vm761_vm12, %v746_v41 }
  0xd3   : > { %v560_v1 = vpop.permute.xlu1 %559  ;;  %v460_v44 = vpop.permute.xlu0 %459 }
  0xd4   : > { %v713_v20 = vsel %vm707_vm7, %v704_v17, %v560_v1  ;;  %v687_v28 = vsel %vm680_vm4, %v1341_v11, %v460_v44 }
  0xd7   : > { %v663_v3 = vpop.permute.xlu1 %662  ;;  %v585_v52 = vpop.permute.xlu0 %584 }
  0xd8   : > { %v747_v48 = vsel %vm743_vm11, %v738_v51, %v663_v3  ;;  %v721_v7 = vsel %vm716_vm8, %v712_v0, %v585_v52 }
  0xd9   : > { %1117 = vmatmul.mubr.msk.f32.gmra.mrb[2].mxu0 %vm761_vm12, %v747_v48 }
  0xdb   : > { %v509_v50 = vpop.permute.xlu1 %508  ;;  %v462_v53 = vpop.permute.xlu0 %461 }
  0xdc   : > { %v688_v6 = vsel %vm680_vm4, %v1360_v25, %v462_v53  ;;  %v696_v34 = vsel %vm689_vm5, %v687_v28, %v509_v50 }
  0xdf   : > { %v610_v54 = vpop.permute.xlu1 %609  ;;  %v587_v55 = vpop.permute.xlu0 %586 }
  0xe0   : > { %v730_v8 = vsel %vm725_vm9, %v721_v7, %v610_v54  ;;  %v722_v21 = vsel %vm716_vm8, %v713_v20, %v587_v55 }
  0xe3   : > { %v534_v2 = vpop.permute.xlu1 %533  ;;  %v511_v56 = vpop.permute.xlu0 %510 }
  0xe4   : > { %v697_v13 = vsel %vm689_vm5, %v688_v6, %v511_v56  ;;  %v705_v35 = vsel %vm698_vm6, %v696_v34, %v534_v2 }
  0xe7   : > { %v638_v57 = vpop.permute.xlu1 %637  ;;  %v612_v58 = vpop.permute.xlu0 %611 }
  0xe8   : > { %v739_v9 = vsel %vm734_vm10, %v730_v8, %v638_v57  ;;  %v731_v22 = vsel %vm725_vm9, %v722_v21, %v612_v58 }
  0xeb   : > { %v562_v62 = vpop.permute.xlu1 %561  ;;  %v536_v63 = vpop.permute.xlu0 %535 }
  0xec   : > { %v706_v14 = vsel %vm698_vm6, %v697_v13, %v536_v63  ;;  %v714_v10 = vsel %vm707_vm7, %v705_v35, %v562_v62 }
  0xef   : > { %v665_v12 = vpop.permute.xlu1 %664  ;;  %v640_v15 = vpop.permute.xlu0 %639 }
  0xf0   : > { %v748_v16 = vsel %vm743_vm11, %v739_v9, %v665_v12  ;;  %v740_v23 = vsel %vm734_vm10, %v731_v22, %v640_v15 }
  0xf1   : > { %1119 = vmatprep.mubr.msk.f32.mxu1 %vm761_vm12, %v748_v16 }
  0xf3   : > { %v589_v18 = vpop.permute.xlu1 %588  ;;  %v564_v19 = vpop.permute.xlu0 %563 }
  0xf4   : > { %v715_v37 = vsel %vm707_vm7, %v706_v14, %v564_v19  ;;  %v723_v11 = vsel %vm716_vm8, %v714_v10, %v589_v18 }
  0xf7   : > { %v591_v47 = vpop.permute.xlu1 %590  ;;  %v667_v26 = vpop.permute.xlu0 %666 }
  0xf8   : > { %v749_v33 = vsel %vm743_vm11, %v740_v23, %v667_v26  ;;  %v724_v38 = vsel %vm716_vm8, %v715_v37, %v591_v47 }
  0xf9   : > { %1120 = vmatmul.mubr.msk.f32.vlgmr.msra.gmra.mrb[0].mxu1 %vm761_vm12, %v749_v33 }
  0xfb   : > { %v616_v24 = vpop.permute.xlu1 %615  ;;  %v614_v27 = vpop.permute.xlu0 %613 }
  0xfc   : > { %v733_v25 = vsel %vm725_vm9, %v724_v38, %v616_v24  ;;  %v732_v39 = vsel %vm725_vm9, %v723_v11, %v614_v27 }
  0xff   : > { %v644_v36 = vpop.permute.xlu1 %643  ;;  %v642_v4 = vpop.permute.xlu0 %641 }
 0x100   : > { %v742_v29 = vsel %vm734_vm10, %v733_v25, %v644_v36  ;;  %v741_v40 = vsel %vm734_vm10, %v732_v39, %v642_v4 }
 0x103   : > { %v671_v32 = vpop.permute.xlu1 %670  ;;  %v669_v41 = vpop.permute.xlu0 %668 }
 0x104   : > { %v751_v30 = vsel %vm743_vm11, %v742_v29, %v671_v32  ;;  %v750_v42 = vsel %vm743_vm11, %v741_v40, %v669_v41 }
 0x105   : > { %1122 = vmatprep.mubr.msk.f32.mxu1 %vm761_vm12, %v750_v42 }
 0x106   : > { %1123 = vmatmul.mubr.msk.f32.gmra.mrb[2].mxu1 %vm761_vm12, %v751_v30 }
 0x18c   : > { %v1115_v43 = vpop.f32.mrb[0].mxu0 }
 0x18d   : > { %892 = vst.msk [vmem:[%s1637_s10 + $0x8] sm:$0xff] %vm680_vm4, %v1115_v43  ;;  %v900_v1 = vsel %vm680_vm4, %v1115_v43, 0.0  ;;  %v923_v44 = vmul.f32 %v1115_v43, %v1115_v43  ;;  %v852_v45 = vpop.f32.mrb[1].mxu0 }
 0x18e   : > { %891 = vst.msk [vmem:[%s1637_s10] sm:$0xff] %vm680_vm4, %v852_v45  ;;  %v899_v46 = vsel %vm680_vm4, %v852_v45, 0.0  ;;  %v922_v49 = vmul.f32 %v852_v45, %v852_v45 }
 0x18f   : > { %v931_v51 = vsel %vm680_vm4, %v923_v44, 0.0  ;;  %v901_v3 = vadd.f32 %v900_v1, %v899_v46 }
 0x190   : > { %v930_v52 = vsel %vm680_vm4, %v922_v49, 0.0 }
 0x191   : > { %v932_v48 = vadd.f32 %v931_v51, %v930_v52 }
 0x1ac   : > { %v1118_v50 = vpop.f32.mrb[2].mxu0 }
 0x1ad   : > { %894 = vst.msk [vmem:[%s1637_s10 + $0x18] sm:$0xff] %vm680_vm4, %v1118_v50  ;;  %v862_v53 = vpop.f32.mrb[3].mxu0  ;;  %v925_v54 = vmul.f32 %v1118_v50, %v1118_v50  ;;  %v904_v57 = vsel %vm680_vm4, %v1118_v50, 0.0 }
 0x1ae   : > { %893 = vst.msk [vmem:[%s1637_s10 + $0x10] sm:$0xff] %vm680_vm4, %v862_v53  ;;  %v902_v55 = vsel %vm680_vm4, %v862_v53, 0.0  ;;  %v924_v2 = vmul.f32 %v862_v53, %v862_v53 }
 0x1af   : > { %v903_v56 = vadd.f32 %v902_v55, %v901_v3  ;;  %v935_v61 = vsel %vm680_vm4, %v925_v54, 0.0 }
 0x1b0   : > { %v933_v58 = vsel %vm680_vm4, %v924_v2, 0.0 }
 0x1b1   : > { %v905_v59 = vadd.f32 %v904_v57, %v903_v56  ;;  %v934_v60 = vadd.f32 %v933_v58, %v932_v48 }
 0x1b3   : > { %v936_v62 = vadd.f32 %v935_v61, %v934_v60 }
 0x1cc   : > { %v1121_v63 = vpop.f32.mrb[0].mxu1 }
 0x1cd   : > { %896 = vst.msk [vmem:[%s1637_s10 + $0x28] sm:$0xff] %vm680_vm4, %v1121_v63  ;;  %v872_v0 = vpop.f32.mrb[1].mxu1  ;;  %v927_v7 = vmul.f32 %v1121_v63, %v1121_v63  ;;  %v908_v15 = vsel %vm680_vm4, %v1121_v63, 0.0 }
 0x1ce   : > { %895 = vst.msk [vmem:[%s1637_s10 + $0x20] sm:$0xff] %vm680_vm4, %v872_v0  ;;  %v906_v8 = vsel %vm680_vm4, %v872_v0, 0.0  ;;  %v926_v9 = vmul.f32 %v872_v0, %v872_v0 }
 0x1cf   : > { %v907_v12 = vadd.f32 %v906_v8, %v905_v59  ;;  %v939_v17 = vsel %vm680_vm4, %v927_v7, 0.0 }
 0x1d0   : > { %v937_v16 = vsel %vm680_vm4, %v926_v9, 0.0 }
 0x1d1   : > { %v938_v5 = vadd.f32 %v937_v16, %v936_v62  ;;  %v909_v31 = vadd.f32 %v908_v15, %v907_v12 }
 0x1d3   : > { %v940_v18 = vadd.f32 %v939_v17, %v938_v5 }
 0x1d9   : > { %v1124_v19 = vpop.f32.mrb[2].mxu1 }
 0x1da   : > { %898 = vst.msk [vmem:[%s1637_s10 + $0x38] sm:$0xff] %vm680_vm4, %v1124_v19  ;;  %v882_v20 = vpop.f32.mrb[3].mxu1  ;;  %v929_v21 = vmul.f32 %v1124_v19, %v1124_v19  ;;  %v912_v26 = vsel %vm680_vm4, %v1124_v19, 0.0 }
 0x1db   : > { %897 = vst.msk [vmem:[%s1637_s10 + $0x30] sm:$0xff] %vm680_vm4, %v882_v20  ;;  %v910_v22 = vsel %vm680_vm4, %v882_v20, 0.0  ;;  %v928_v23 = vmul.f32 %v882_v20, %v882_v20 }
 0x1dc   : > { %v911_v47 = vadd.f32 %v910_v22, %v909_v31  ;;  %v943_v28 = vsel %vm680_vm4, %v929_v21, 0.0 }
 0x1dd   : > { %v941_v33 = vsel %vm680_vm4, %v928_v23, 0.0 }
 0x1de   : > { %v913_v24 = vadd.f32 %v912_v26, %v911_v47  ;;  %v942_v27 = vadd.f32 %v941_v33, %v940_v18 }
 0x1e0   : > { %v914_v6 = vrot.slane %v913_v24, 4  ;;  %v944_v34 = vadd.f32 %v943_v28, %v942_v27 }
 0x1e2   : > { %v915_v13 = vadd.f32 %v914_v6, %v913_v24  ;;  %v945_v35 = vrot.slane %v944_v34, 4 }
 0x1e4   : > { %v916_v14 = vrot.slane %v915_v13, 2  ;;  %v946_v36 = vadd.f32 %v945_v35, %v944_v34 }
 0x1e6   : > { %v917_v4 = vadd.f32 %v916_v14, %v915_v13  ;;  %v947_v10 = vrot.slane %v946_v36, 2 }
 0x1e8   : > { %v918_v37 = vrot.slane %v917_v4, 1  ;;  %v948_v11 = vadd.f32 %v947_v10, %v946_v36 }
 0x1ea   : > { %v919_v38 = vadd.f32 %v918_v37, %v917_v4  ;;  %v949_v25 = vrot.slane %v948_v11, 1 }
 0x1ec   : > { %921 = vst.msk [vmem:[%s265_s17] sm:$0x1] %vm920_vm13, %v919_v38  ;;  %v950_v39 = vadd.f32 %v949_v25, %v948_v11 }
 0x1ee   : > { %951 = vst.msk [vmem:[%s268_s20] sm:$0x1] %vm920_vm13, %v950_v39 }
 0x1ef PF: > { %s17_s21 = sadd.s32 1, %s1175_s21  }
 0x1f0   : > { %p14_p4 = scmp.ge.s32.totalorder %s17_s21, 4  }
 0x1f2   :  { %16 = sbr.rel (!%p14_p4) target bundleno = 1 (0x1), region = 90 }

// kernel: basic_block_forward.3
= control target key start
LH: loop header
LB: loop body
LE: loop exit
PB: predicated region body
PF: predicated region fallthrough
CT: control target
= control target key end

     0   :  { %s1585_s27 = smov 0   ;;  %s1955_s0 = inlined_call_operand.vmem [shape: f32[2,4,9,9,4], index: 0, kind: input, shape index: {}]   ;;  %s1956_s1 = inlined_call_operand.vmem [shape: f32[36,8], index: 1, kind: input, shape index: {}]   ;;  %s1957_s2 = inlined_call_operand.vmem [shape: f32[4,8], index: 2, kind: input, shape index: {}]   ;;  %s1958_s3 = inlined_call_operand.vmem [shape: f32[2,64,8], index: 3, kind: output, shape index: {0}]   ;;  %s1959_s4 = inlined_call_operand.vmem [shape: f32[2,1,8], index: 4, kind: output, shape index: {1}]   ;;  %s1960_s5 = inlined_call_operand.vmem [shape: f32[2,1,8], index: 5, kind: output, shape index: {2}]   ;;  %s1961_s6 = inlined_call_operand.vmem [shape: f32[2,64,8], index: 6, kind: output, shape index: {3}]   ;;  %s1962_s7 = inlined_call_operand.vmem [shape: f32[2,1,8], index: 7, kind: output, shape index: {4}]   ;;  %s1963_s8 = inlined_call_operand.vmem [shape: f32[2,1,8], index: 8, kind: output, shape index: {5}]  }
   0x1 LB: > { %s1345_s28 = sadd.s32 4294967295, %s1530_s27   ;;  %p1349_p0 = scmp.ge.s32.totalorder %s1530_s27, 1  ;;  %s1530_s27 = sphi %s1585_s27, %s19_s27  }
   0x2   : > { %p273_p1 = scmp.lt.s32.totalorder %s1530_s27, 3 }
   0x4   : > { %p274_p2 = pnand %p1349_p0, %p273_p1 }
   0x5   : > { %p324_p3 = scmp.lt.s32.totalorder (!%p274_p2), %s1345_s28, 1  ;;  %s1532_s11 = smov (!%p274_p2), 8   ;;  %vm684_vm0 = vcmask (!%p274_p2), 31744   ;;  %v756_v14 = vld [vmem:[%s1956_s1] sm:$0xff] (!%p274_p2)  ;;  %v757_v15 = vld [vmem:[%s1956_s1 + $0x8] sm:$0xff] (!%p274_p2)  ;;  %v758_v19 = vld [vmem:[%s1956_s1 + $0x10] sm:$0xff] (!%p274_p2) }
   0x6   : > { %277 = sbr.rel (%p274_p2) target bundleno = 492 (0x1ec), region = 32  ;;  %s1533_s12 = smov (!%p274_p2), 4   ;;  %v1499_v16 = vpack.c.bf16 (!%p274_p2), %v757_v15, %v756_v14  ;;  %v759_v20 = vld [vmem:[%s1956_s1 + $0x18] sm:$0xff] (!%p274_p2)  ;;  %v760_v23 = vld [vmem:[%s1956_s1 + $0x20] sm:$0xf] (!%p274_p2)  ;;  %vm786_vm1 = vcmask (!%p274_p2), 1043456  }
   0x7   : > { %s1534_s13 = smov (!%p274_p2), 12   ;;  %s1535_s14 = smov (!%p274_p2), 16   ;;  %v1503_v21 = vpack.c.bf16 (!%p274_p2), %v759_v20, %v758_v19  ;;  %v964_v45 = vld [vmem:[%s1957_s2] sm:$0xf] (!%p274_p2)  ;;  %vm693_vm2 = vcmask (!%p274_p2), 64512   ;;  %vm702_vm3 = vcmask (!%p274_p2), 97280  }
   0x8   : > { %s1536_s15 = smov (!%p274_p2), 20   ;;  %s1537_s20 = smov (!%p274_p2), 24   ;;  %1500 = vmatprep.subr.bf16.mxu0 (!%p274_p2), %v1499_v16  ;;  %1485 = vmatprep.subr.msk.mxu1 (!%p274_p2), %vm786_vm1, %v964_v45  ;;  %vm711_vm4 = vcmask (!%p274_p2), 130048   ;;  %vm720_vm5 = vcmask (!%p274_p2), 162816   ;;  %vm729_vm6 = vcmask (!%p274_p2), 195584   ;;  %vm738_vm7 = vcmask (!%p274_p2), 228352  }
   0x9   : > { %1502 = vmatpush3.bf16.msra.mxu0 (!%p274_p2), %v1499_v16  ;;  %s1539_s30 = smov (!%p274_p2), 32   ;;  %1486 = vmatpush3.msk.msra.mxu1 (!%p274_p2), %vm786_vm1, %v964_v45  ;;  %vm747_vm8 = vcmask (!%p274_p2), 261120   ;;  %vm761_vm9 = vcmask (!%p274_p2), 293888   ;;  %vm924_vm10 = vcmask (!%p274_p2), 57344  }
   0xa   : > { %1504 = vmatprep.subr.bf16.mxu0 (!%p274_p2), %v1503_v21 }
   0xd   : > { %s1965_s28 = smov (!%p324_p3, %s1345_s28), 1  ;;  %1506 = vmatpush3.bf16.msra.mxu0 %v1503_v21 }
   0xe   : > { %s1507_s29 = smul.u32 576, %s1965_s28  ;;  %1471 = vmatprep.subr.msk.mxu0 %vm786_vm1, %v760_v23  ;;  %s347_s17 = scalar_lea.vmem %s1962_s7, %s1965_s28 }
   0xf   : > { %s336_s26 = scalar_lea.vmem %s1959_s4, %s1965_s28  ;;  %s339_s9 = scalar_lea.vmem %s1960_s5, %s1965_s28 }
  0x10   : > { %s1599_s10 = scalar_lea.vmem %s1955_s0, %s1507_s29  ;;  %s1538_s29 = smov 28  }
  0x11   : > { %v368_v0 = vld [vmem:[%s1599_s10 + $0x1] sm:$0xff]  ;;  %v1355_v1 = vld [vmem:[%s1599_s10 + $0x90] sm:$0xff]  ;;  %1472 = vmatpush3.msk.msra.mxu0 %vm786_vm1, %v760_v23 }
  0x12   : > { %468 = vrot.lane.b32.xlu1 %v368_v0, %s1532_s11  ;;  %436 = vrot.lane.b32.xlu0 %v1355_v1, %s1533_s12  ;;  %v369_v2 = vld [vmem:[%s1599_s10 + $0x11] sm:$0xff]  ;;  %v1356_v3 = vld [vmem:[%s1599_s10 + $0xa0] sm:$0xff] }
  0x13   : > { %v1371_v4 = vld [vmem:[%s1599_s10 + $0x1b0] sm:$0xff]  ;;  %v1363_v6 = vld [vmem:[%s1599_s10 + $0x120] sm:$0xff] }
  0x14   : > { %1487 = vmatprep.mubr.msk.f32.mxu1 %vm684_vm0, %v1371_v4  ;;  %v1364_v5 = vld [vmem:[%s1599_s10 + $0x130] sm:$0xff]  ;;  %v1379_v8 = vld [vmem:[%s1599_s10 + $0x121] sm:$0xff] }
  0x15   : > { %v1357_v7 = vld [vmem:[%s1599_s10 + $0xb0] sm:$0xff]  ;;  %v1620_v9 = vld [vmem:[%s1599_s10 + $0x1c0] sm:$0xff] }
  0x16   : > { %470 = vrot.lane.b32.xlu1 %v369_v2, %s1532_s11  ;;  %438 = vrot.lane.b32.xlu0 %v1356_v3, %s1533_s12  ;;  %v370_v10 = vld [vmem:[%s1599_s10 + $0x21] sm:$0xff]  ;;  %v1630_v12 = vld [vmem:[%s1599_s10 + $0x10] sm:$0xff] }
  0x17   : > { %v1358_v11 = vld [vmem:[%s1599_s10 + $0xc0] sm:$0xff]  ;;  %v1380_v13 = vld [vmem:[%s1599_s10 + $0x131] sm:$0xff]  ;;  %1488 = vmatmul.mubr.msk.f32.vlgmr.msra.gmra.mrb[0].mxu1 %vm684_vm0, %v1620_v9 }
  0x18   : > { %v1365_v17 = vld [vmem:[%s1599_s10 + $0x140] sm:$0xff]  ;;  %v371_v18 = vld [vmem:[%s1599_s10 + $0x31] sm:$0xff] }
  0x19   : > { %v1653_v22 = vld [vmem:[%s1599_s10 + $0x20] sm:$0xff]  ;;  %v1373_v24 = vld [vmem:[%s1599_s10 + $0x1d0] sm:$0xff] }
  0x1a   : > { %502 = vrot.lane.b32.xlu1 %v1364_v5, %s1534_s13  ;;  %500 = vrot.lane.b32.xlu0 %v1363_v6, %s1534_s13  ;;  %v1366_v25 = vld [vmem:[%s1599_s10 + $0x150] sm:$0xff]  ;;  %v1374_v26 = vld [vmem:[%s1599_s10 + $0x1e0] sm:$0xff] }
  0x1b   : > { %v1359_v27 = vld [vmem:[%s1599_s10 + $0xd0] sm:$0xff]  ;;  %v1381_v28 = vld [vmem:[%s1599_s10 + $0x141] sm:$0xff]  ;;  %1490 = vmatprep.mubr.msk.f32.mxu1 %vm684_vm0, %v1373_v24 }
  0x1c   : > { %v372_v29 = vld [vmem:[%s1599_s10 + $0x41] sm:$0xff]  ;;  %v1681_v31 = vld [vmem:[%s1599_s10 + $0x30] sm:$0xff]  ;;  %1491 = vmatmul.mubr.msk.f32.gmra.mrb[2].mxu1 %vm684_vm0, %v1374_v26 }
  0x1d   : > { %v1360_v30 = vld [vmem:[%s1599_s10 + $0xe0] sm:$0xff]  ;;  %v1382_v32 = vld [vmem:[%s1599_s10 + $0x151] sm:$0xff] }
  0x1e   : > { %440 = vrot.lane.b32.xlu1 %v1357_v7, %s1533_s12  ;;  %532 = vrot.lane.b32.xlu0 %v1371_v4, %s1535_s14  ;;  %v1367_v33 = vld [vmem:[%s1599_s10 + $0x160] sm:$0xff]  ;;  %v373_v34 = vld [vmem:[%s1599_s10 + $0x51] sm:$0xff] }
  0x1f   : > { %v1692_v35 = vld [vmem:[%s1599_s10 + $0x40] sm:$0xff]  ;;  %v1375_v36 = vld [vmem:[%s1599_s10 + $0x1f0] sm:$0xff] }
  0x20   : > { %v1368_v37 = vld [vmem:[%s1599_s10 + $0x170] sm:$0xff]  ;;  %v1376_v38 = vld [vmem:[%s1599_s10 + $0x200] sm:$0xff]  ;;  %1493 = vmatprep.mubr.msk.f32.mxu1 %vm684_vm0, %v1375_v36 }
  0x21   : > { %v1361_v39 = vld [vmem:[%s1599_s10 + $0xf0] sm:$0xff]  ;;  %v1383_v40 = vld [vmem:[%s1599_s10 + $0x161] sm:$0xff]  ;;  %1494 = vmatmul.mubr.msk.f32.gmra.mrb[4].mxu1 %vm684_vm0, %v1376_v38 }
  0x22   : > { %564 = vrot.lane.b32.xlu1 %v1379_v8, %s1536_s15  ;;  %534 = vrot.lane.b32.xlu0 %v1620_v9, %s1535_s14  ;;  %v374_v41 = vld [vmem:[%s1599_s10 + $0x61] sm:$0xff]  ;;  %v1715_v43 = vld [vmem:[%s1599_s10 + $0x50] sm:$0xff] }
  0x23   : > { %v1362_v42 = vld [vmem:[%s1599_s10 + $0x100] sm:$0xff]  ;;  %v1384_v44 = vld [vmem:[%s1599_s10 + $0x171] sm:$0xff] }
  0x24   : > { %v1369_v46 = vld [vmem:[%s1599_s10 + $0x180] sm:$0xff]  ;;  %v375_v47 = vld [vmem:[%s1599_s10 + $0x71] sm:$0xff] }
  0x25   : > { %v1733_v48 = vld [vmem:[%s1599_s10 + $0x60] sm:$0xff]  ;;  %v1377_v49 = vld [vmem:[%s1599_s10 + $0x210] sm:$0xff] }
  0x26   : > { %472 = vrot.lane.b32.xlu1 %v370_v10, %s1532_s11  ;;  %442 = vrot.lane.b32.xlu0 %v1358_v11, %s1533_s12  ;;  %v1370_v50 = vld [vmem:[%s1599_s10 + $0x190] sm:$0xff]  ;;  %v1378_v51 = vld [vmem:[%s1599_s10 + $0x220] sm:$0xff] }
  0x27   : > { %1496 = vmatprep.mubr.msk.f32.mxu1 %vm684_vm0, %v1377_v49  ;;  %v1385_v52 = vld [vmem:[%s1599_s10 + $0x181] sm:$0xff]  ;;  %v1386_v53 = vld [vmem:[%s1599_s10 + $0x191] sm:$0xff] }
  0x28   : > { %1497 = vmatmul.mubr.msk.f32.gmra.mrb[6].mxu1 %vm684_vm0, %v1378_v51  ;;  %v1394_v54 = vld [vmem:[%s1599_s10 + $0x80] sm:$0xff]  ;;  %v1759_v55 = vld [vmem:[%s1599_s10 + $0x70] sm:$0xff] }
  0x29   : > { %v1402_v58 = vld [vmem:[%s1599_s10 + $0x110] sm:$0xff]  ;;  %v1410_v61 = vld [vmem:[%s1599_s10 + $0x81] sm:$0xff] }
  0x2a   : > { %596 = vrot.lane.b32.xlu1 %v1630_v12, %s1537_s20  ;;  %566 = vrot.lane.b32.xlu0 %v1380_v13, %s1536_s15 }
  0x2e   : > { %504 = vrot.lane.b32.xlu1 %v1365_v17, %s1534_s13  ;;  %474 = vrot.lane.b32.xlu0 %v371_v18, %s1532_s11 }
  0x32   : > { %628 = vrot.lane.b32.xlu1 %v1356_v3, %s1538_s29  ;;  %598 = vrot.lane.b32.xlu0 %v1653_v22, %s1537_s20 }
  0x36   : > { %536 = vrot.lane.b32.xlu1 %v1373_v24, %s1535_s14  ;;  %506 = vrot.lane.b32.xlu0 %v1366_v25, %s1534_s13 }
  0x3a   : > { %660 = vrot.lane.b32.xlu1 %v369_v2, %s1539_s30  ;;  %630 = vrot.lane.b32.xlu0 %v1357_v7, %s1538_s29 }
  0x3e   : > { %538 = vrot.lane.b32.xlu1 %v1374_v26, %s1535_s14  ;;  %444 = vrot.lane.b32.xlu0 %v1359_v27, %s1533_s12 }
  0x42   : > { %662 = vrot.lane.b32.xlu1 %v370_v10, %s1539_s30  ;;  %568 = vrot.lane.b32.xlu0 %v1381_v28, %s1536_s15  ;;  %v351_v10 = vld [vmem:[%s1599_s10] sm:$0xff]  ;;  %s1439_s10 = sshll.u32 %s1965_s28, 6 }
  0x43   : > { %s1908_s23 = scalar_lea.vmem %s1958_s3, %s1439_s10 }
  0x46   : > { %476 = vrot.lane.b32.xlu1 %v372_v29, %s1532_s11  ;;  %446 = vrot.lane.b32.xlu0 %v1360_v30, %s1533_s12 }
  0x4a   : > { %600 = vrot.lane.b32.xlu1 %v1681_v31, %s1537_s20  ;;  %570 = vrot.lane.b32.xlu0 %v1382_v32, %s1536_s15 }
  0x4e   : > { %508 = vrot.lane.b32.xlu1 %v1367_v33, %s1534_s13  ;;  %478 = vrot.lane.b32.xlu0 %v373_v34, %s1532_s11 }
  0x52   : > { %632 = vrot.lane.b32.xlu1 %v1358_v11, %s1538_s29  ;;  %602 = vrot.lane.b32.xlu0 %v1692_v35, %s1537_s20 }
  0x56   : > { %540 = vrot.lane.b32.xlu1 %v1375_v36, %s1535_s14  ;;  %510 = vrot.lane.b32.xlu0 %v1368_v37, %s1534_s13 }
  0x5a   : > { %664 = vrot.lane.b32.xlu1 %v371_v18, %s1539_s30  ;;  %634 = vrot.lane.b32.xlu0 %v1359_v27, %s1538_s29 }
  0x5e   : > { %542 = vrot.lane.b32.xlu1 %v1376_v38, %s1535_s14  ;;  %448 = vrot.lane.b32.xlu0 %v1361_v39, %s1533_s12 }
  0x62   : > { %666 = vrot.lane.b32.xlu1 %v372_v29, %s1539_s30  ;;  %572 = vrot.lane.b32.xlu0 %v1383_v40, %s1536_s15 }
  0x66   : > { %480 = vrot.lane.b32.xlu1 %v374_v41, %s1532_s11  ;;  %450 = vrot.lane.b32.xlu0 %v1362_v42, %s1533_s12 }
  0x6a   : > { %604 = vrot.lane.b32.xlu1 %v1715_v43, %s1537_s20  ;;  %574 = vrot.lane.b32.xlu0 %v1384_v44, %s1536_s15 }
  0x6e   : > { %512 = vrot.lane.b32.xlu1 %v1369_v46, %s1534_s13  ;;  %482 = vrot.lane.b32.xlu0 %v375_v47, %s1532_s11 }
  0x72   : > { %636 = vrot.lane.b32.xlu1 %v1360_v30, %s1538_s29  ;;  %606 = vrot.lane.b32.xlu0 %v1733_v48, %s1537_s20 }
  0x76   : > { %544 = vrot.lane.b32.xlu1 %v1377_v49, %s1535_s14  ;;  %514 = vrot.lane.b32.xlu0 %v1370_v50, %s1534_s13  ;;  %s1859_s13 = scalar_lea.vmem %s1961_s6, %s1439_s10 }
  0x7a   : > { %668 = vrot.lane.b32.xlu1 %v373_v34, %s1539_s30  ;;  %638 = vrot.lane.b32.xlu0 %v1361_v39, %s1538_s29 }
  0x7e   : > { %576 = vrot.lane.b32.xlu1 %v1385_v52, %s1536_s15  ;;  %546 = vrot.lane.b32.xlu0 %v1378_v51, %s1535_s14 }
  0x82   : > { %578 = vrot.lane.b32.xlu1 %v1386_v53, %s1536_s15  ;;  %670 = vrot.lane.b32.xlu0 %v374_v41, %s1539_s30 }
  0x84   : > { %v469_v56 = vpop.permute.xlu1 %468  ;;  %v437_v57 = vpop.permute.xlu0 %436 }
  0x85   : > { %v685_v11 = vsel %vm684_vm0, %v351_v10, %v437_v57 }
  0x86   : > { %610 = vrot.lane.b32.xlu1 %v1394_v54, %s1537_s20  ;;  %608 = vrot.lane.b32.xlu0 %v1759_v55, %s1537_s20  ;;  %v694_v15 = vsel %vm693_vm2, %v685_v11, %v469_v56  ;;  %s350_s20 = scalar_lea.vmem %s1963_s8, %s1965_s28 }
  0x88   : > { %v471_v59 = vpop.permute.xlu1 %470  ;;  %v439_v60 = vpop.permute.xlu0 %438 }
  0x89   : > { %v686_v23 = vsel %vm684_vm0, %v1630_v12, %v439_v60 }
  0x8a   : > { %642 = vrot.lane.b32.xlu1 %v1402_v58, %s1538_s29  ;;  %640 = vrot.lane.b32.xlu0 %v1362_v42, %s1538_s29  ;;  %v695_v28 = vsel %vm693_vm2, %v686_v23, %v471_v59 }
  0x8c   : > { %v503_v62 = vpop.permute.xlu1 %502  ;;  %v501_v63 = vpop.permute.xlu0 %500 }
  0x8d   : > { %v703_v16 = vsel %vm702_vm3, %v694_v15, %v501_v63  ;;  %v704_v29 = vsel %vm702_vm3, %v695_v28, %v503_v62 }
  0x8e   : > { %674 = vrot.lane.b32.xlu1 %v1410_v61, %s1539_s30  ;;  %672 = vrot.lane.b32.xlu0 %v375_v47, %s1539_s30 }
  0x90   : > { %v441_v0 = vpop.permute.xlu1 %440  ;;  %v533_v1 = vpop.permute.xlu0 %532 }
  0x91   : > { %v712_v19 = vsel %vm711_vm4, %v703_v16, %v533_v1  ;;  %v687_v50 = vsel %vm684_vm0, %v1653_v22, %v441_v0 }
  0x94   : > { %v565_v2 = vpop.permute.xlu1 %564  ;;  %v535_v3 = vpop.permute.xlu0 %534 }
  0x95   : > { %v721_v20 = vsel %vm720_vm5, %v712_v19, %v565_v2  ;;  %v713_v33 = vsel %vm711_vm4, %v704_v29, %v535_v3 }
  0x98   : > { %v473_v4 = vpop.permute.xlu1 %472  ;;  %v1770_v5 = vpop.permute.xlu0 %442 }
  0x99   : > { %v696_v51 = vsel %vm693_vm2, %v687_v50, %v473_v4  ;;  %v688_v22 = vsel %vm684_vm0, %v1681_v31, %v1770_v5 }
  0x9c   : > { %v597_v6 = vpop.permute.xlu1 %596  ;;  %v567_v7 = vpop.permute.xlu0 %566 }
  0x9d   : > { %v730_v21 = vsel %vm729_vm6, %v721_v20, %v597_v6  ;;  %v722_v34 = vsel %vm720_vm5, %v713_v33, %v567_v7 }
  0xa0   : > { %v505_v8 = vpop.permute.xlu1 %504  ;;  %v475_v9 = vpop.permute.xlu0 %474 }
  0xa1   : > { %v705_v52 = vsel %vm702_vm3, %v696_v51, %v505_v8  ;;  %v697_v63 = vsel %vm693_vm2, %v688_v22, %v475_v9 }
  0xa4   : > { %v629_v13 = vpop.permute.xlu1 %628  ;;  %v599_v14 = vpop.permute.xlu0 %598 }
  0xa5   : > { %v739_v24 = vsel %vm738_vm7, %v730_v21, %v629_v13  ;;  %v731_v12 = vsel %vm729_vm6, %v722_v34, %v599_v14 }
  0xa8   : > { %v537_v17 = vpop.permute.xlu1 %536  ;;  %v507_v18 = vpop.permute.xlu0 %506 }
  0xa9   : > { %v714_v56 = vsel %vm711_vm4, %v705_v52, %v537_v17  ;;  %v706_v0 = vsel %vm702_vm3, %v697_v63, %v507_v18 }
  0xac   : > { %v661_v25 = vpop.permute.xlu1 %660  ;;  %v631_v26 = vpop.permute.xlu0 %630 }
  0xad   : > { %v748_v27 = vsel %vm747_vm8, %v739_v24, %v661_v25  ;;  %v740_v36 = vsel %vm738_vm7, %v731_v12, %v631_v26 }
  0xae   : > { %1473 = vmatprep.mubr.msk.f32.mxu0 %vm761_vm9, %v748_v27 }
  0xb0   : > { %v539_v30 = vpop.permute.xlu1 %538  ;;  %v445_v32 = vpop.permute.xlu0 %444 }
  0xb1   : > { %v715_v3 = vsel %vm711_vm4, %v706_v0, %v539_v30  ;;  %v689_v18 = vsel %vm684_vm0, %v1692_v35, %v445_v32 }
  0xb4   : > { %v663_v37 = vpop.permute.xlu1 %662  ;;  %v569_v38 = vpop.permute.xlu0 %568 }
  0xb5   : > { %v749_v39 = vsel %vm747_vm8, %v740_v36, %v663_v37  ;;  %v723_v57 = vsel %vm720_vm5, %v714_v56, %v569_v38 }
  0xb6   : > { %1474 = vmatmul.mubr.msk.f32.vlgmr.msra.gmra.mrb[0].mxu0 %vm761_vm9, %v749_v39 }
  0xb8   : > { %v477_v40 = vpop.permute.xlu1 %476  ;;  %v447_v41 = vpop.permute.xlu0 %446 }
  0xb9   : > { %v698_v19 = vsel %vm693_vm2, %v689_v18, %v477_v40  ;;  %v690_v35 = vsel %vm684_vm0, %v1715_v43, %v447_v41 }
  0xbc   : > { %v601_v42 = vpop.permute.xlu1 %600  ;;  %v571_v44 = vpop.permute.xlu0 %570 }
  0xbd   : > { %v732_v58 = vsel %vm729_vm6, %v723_v57, %v601_v42  ;;  %v724_v4 = vsel %vm720_vm5, %v715_v3, %v571_v44 }
  0xc0   : > { %v509_v45 = vpop.permute.xlu1 %508  ;;  %v479_v46 = vpop.permute.xlu0 %478 }
  0xc1   : > { %v707_v20 = vsel %vm702_vm3, %v698_v19, %v509_v45  ;;  %v699_v32 = vsel %vm693_vm2, %v690_v35, %v479_v46 }
  0xc4   : > { %v633_v47 = vpop.permute.xlu1 %632  ;;  %v603_v49 = vpop.permute.xlu0 %602 }
  0xc5   : > { %v741_v59 = vsel %vm738_vm7, %v732_v58, %v633_v47  ;;  %v733_v6 = vsel %vm729_vm6, %v724_v4, %v603_v49 }
  0xc8   : > { %v541_v53 = vpop.permute.xlu1 %540  ;;  %v511_v54 = vpop.permute.xlu0 %510 }
  0xc9   : > { %v716_v24 = vsel %vm711_vm4, %v707_v20, %v541_v53  ;;  %v708_v33 = vsel %vm702_vm3, %v699_v32, %v511_v54 }
  0xcc   : > { %v665_v60 = vpop.permute.xlu1 %664  ;;  %v635_v61 = vpop.permute.xlu0 %634 }
  0xcd   : > { %v750_v62 = vsel %vm747_vm8, %v741_v59, %v665_v60  ;;  %v742_v7 = vsel %vm738_vm7, %v733_v6, %v635_v61 }
  0xce   : > { %1476 = vmatprep.mubr.msk.f32.mxu0 %vm761_vm9, %v750_v62 }
  0xd0   : > { %v543_v1 = vpop.permute.xlu1 %542  ;;  %v449_v2 = vpop.permute.xlu0 %448 }
  0xd1   : > { %v717_v36 = vsel %vm711_vm4, %v708_v33, %v543_v1  ;;  %v691_v45 = vsel %vm684_vm0, %v1733_v48, %v449_v2 }
  0xd4   : > { %v667_v8 = vpop.permute.xlu1 %666  ;;  %v573_v10 = vpop.permute.xlu0 %572 }
  0xd5   : > { %v751_v31 = vsel %vm747_vm8, %v742_v7, %v667_v8  ;;  %v725_v25 = vsel %vm720_vm5, %v716_v24, %v573_v10 }
  0xd6   : > { %1477 = vmatmul.mubr.msk.f32.gmra.mrb[2].mxu0 %vm761_vm9, %v751_v31 }
  0xd8   : > { %v481_v5 = vpop.permute.xlu1 %480  ;;  %v451_v9 = vpop.permute.xlu0 %450 }
  0xd9   : > { %v692_v46 = vsel %vm684_vm0, %v1759_v55, %v451_v9  ;;  %v700_v47 = vsel %vm693_vm2, %v691_v45, %v481_v5 }
  0xdc   : > { %v605_v11 = vpop.permute.xlu1 %604  ;;  %v575_v13 = vpop.permute.xlu0 %574 }
  0xdd   : > { %v734_v26 = vsel %vm729_vm6, %v725_v25, %v605_v11  ;;  %v726_v37 = vsel %vm720_vm5, %v717_v36, %v575_v13 }
  0xe0   : > { %v513_v14 = vpop.permute.xlu1 %512  ;;  %v483_v15 = vpop.permute.xlu0 %482 }
  0xe1   : > { %v701_v49 = vsel %vm693_vm2, %v692_v46, %v483_v15  ;;  %v709_v50 = vsel %vm702_vm3, %v700_v47, %v513_v14 }
  0xe4   : > { %v637_v16 = vpop.permute.xlu1 %636  ;;  %v607_v17 = vpop.permute.xlu0 %606 }
  0xe5   : > { %v743_v27 = vsel %vm738_vm7, %v734_v26, %v637_v16  ;;  %v735_v38 = vsel %vm729_vm6, %v726_v37, %v607_v17 }
  0xe8   : > { %v545_v21 = vpop.permute.xlu1 %544  ;;  %v515_v23 = vpop.permute.xlu0 %514 }
  0xe9   : > { %v710_v51 = vsel %vm702_vm3, %v701_v49, %v515_v23  ;;  %v718_v54 = vsel %vm711_vm4, %v709_v50, %v545_v21 }
  0xea   : > { %v1489_v0 = vpop.f32.mrb[0].mxu1 }
  0xeb   : > { %1098 = vst.msk [vmem:[%s1859_s13 + $0x8] sm:$0xff] %vm693_vm2, %v1489_v0  ;;  %v1106_v1 = vsel %vm693_vm2, %v1489_v0, 0.0  ;;  %v1128_v2 = vmul.f32 %v1489_v0, %v1489_v0  ;;  %v1058_v3 = vpop.f32.mrb[1].mxu1 }
  0xec   : > { %v669_v28 = vpop.permute.xlu1 %668  ;;  %v639_v29 = vpop.permute.xlu0 %638  ;;  %1097 = vst.msk [vmem:[%s1859_s13] sm:$0xff] %vm693_vm2, %v1058_v3  ;;  %v1105_v4 = vsel %vm693_vm2, %v1058_v3, 0.0  ;;  %v1127_v6 = vmul.f32 %v1058_v3, %v1058_v3 }
  0xed   : > { %v752_v30 = vsel %vm747_vm8, %v743_v27, %v669_v28  ;;  %v744_v39 = vsel %vm738_vm7, %v735_v38, %v639_v29  ;;  %v1136_v7 = vsel %vm693_vm2, %v1128_v2, 0.0  ;;  %v1107_v8 = vadd.f32 %v1106_v1, %v1105_v4 }
  0xee   : > { %1479 = vmatprep.mubr.msk.f32.mxu0 %vm761_vm9, %v752_v30  ;;  %v1135_v10 = vsel %vm693_vm2, %v1127_v6, 0.0 }
  0xef   : > { %v1492_v31 = vpop.f32.mrb[2].mxu1  ;;  %v1137_v5 = vadd.f32 %v1136_v7, %v1135_v10 }
  0xf0   : > { %v577_v34 = vpop.permute.xlu1 %576  ;;  %v547_v12 = vpop.permute.xlu0 %546  ;;  %1100 = vst.msk [vmem:[%s1859_s13 + $0x18] sm:$0xff] %vm693_vm2, %v1492_v31  ;;  %v1130_v9 = vmul.f32 %v1492_v31, %v1492_v31  ;;  %v1110_v15 = vsel %vm693_vm2, %v1492_v31, 0.0 }
  0xf1   : > { %v719_v56 = vsel %vm711_vm4, %v710_v51, %v547_v12  ;;  %v727_v48 = vsel %vm720_vm5, %v718_v54, %v577_v34  ;;  %v1068_v11 = vpop.f32.mrb[3].mxu1 }
  0xf2   : > { %1099 = vst.msk [vmem:[%s1859_s13 + $0x10] sm:$0xff] %vm693_vm2, %v1068_v11  ;;  %v1108_v13 = vsel %vm693_vm2, %v1068_v11, 0.0  ;;  %v1129_v14 = vmul.f32 %v1068_v11, %v1068_v11  ;;  %v1140_v18 = vsel %vm693_vm2, %v1130_v9, 0.0 }
  0xf3   : > { %v1109_v16 = vadd.f32 %v1108_v13, %v1107_v8 }
  0xf4   : > { %v579_v40 = vpop.permute.xlu1 %578  ;;  %v671_v42 = vpop.permute.xlu0 %670  ;;  %v1138_v17 = vsel %vm693_vm2, %v1129_v14, 0.0 }
  0xf5   : > { %v753_v43 = vsel %vm747_vm8, %v744_v39, %v671_v42  ;;  %v728_v55 = vsel %vm720_vm5, %v719_v56, %v579_v40  ;;  %v1139_v19 = vadd.f32 %v1138_v17, %v1137_v5  ;;  %v1495_v20 = vpop.f32.mrb[4].mxu1  ;;  %v1111_v23 = vadd.f32 %v1110_v15, %v1109_v16 }
  0xf6   : > { %1480 = vmatmul.mubr.msk.f32.gmra.mrb[4].mxu0 %vm761_vm9, %v753_v43  ;;  %1102 = vst.msk [vmem:[%s1859_s13 + $0x28] sm:$0xff] %vm693_vm2, %v1495_v20  ;;  %v1078_v21 = vpop.f32.mrb[5].mxu1  ;;  %v1114_v26 = vsel %vm693_vm2, %v1495_v20, 0.0  ;;  %v1132_v27 = vmul.f32 %v1495_v20, %v1495_v20 }
  0xf7   : > { %1101 = vst.msk [vmem:[%s1859_s13 + $0x20] sm:$0xff] %vm693_vm2, %v1078_v21  ;;  %v1112_v24 = vsel %vm693_vm2, %v1078_v21, 0.0  ;;  %v1131_v25 = vmul.f32 %v1078_v21, %v1078_v21  ;;  %v1141_v29 = vadd.f32 %v1140_v18, %v1139_v19 }
  0xf8   : > { %v611_v41 = vpop.permute.xlu1 %610  ;;  %v609_v44 = vpop.permute.xlu0 %608  ;;  %v1113_v28 = vadd.f32 %v1112_v24, %v1111_v23  ;;  %v1144_v32 = vsel %vm693_vm2, %v1132_v27, 0.0 }
  0xf9   : > { %v737_v57 = vsel %vm729_vm6, %v728_v55, %v611_v41  ;;  %v736_v58 = vsel %vm729_vm6, %v727_v48, %v609_v44  ;;  %v1142_v30 = vsel %vm693_vm2, %v1131_v25, 0.0 }
  0xfa   : > { %v1143_v33 = vadd.f32 %v1142_v30, %v1141_v29  ;;  %v1115_v36 = vadd.f32 %v1114_v26, %v1113_v28 }
  0xfb   : > { %v1498_v35 = vpop.f32.mrb[6].mxu1 }
  0xfc   : > { %v643_v52 = vpop.permute.xlu1 %642  ;;  %v641_v53 = vpop.permute.xlu0 %640  ;;  %1104 = vst.msk [vmem:[%s1859_s13 + $0x38] sm:$0xff] %vm693_vm2, %v1498_v35  ;;  %v1134_v34 = vmul.f32 %v1498_v35, %v1498_v35  ;;  %v1118_v39 = vsel %vm693_vm2, %v1498_v35, 0.0  ;;  %v1145_v40 = vadd.f32 %v1144_v32, %v1143_v33 }
  0xfd   : > { %v746_v59 = vsel %vm738_vm7, %v737_v57, %v643_v52  ;;  %v745_v60 = vsel %vm738_vm7, %v736_v58, %v641_v53  ;;  %v1088_v12 = vpop.f32.mrb[7].mxu1 }
  0xfe   : > { %1103 = vst.msk [vmem:[%s1859_s13 + $0x30] sm:$0xff] %vm693_vm2, %v1088_v12  ;;  %v1116_v37 = vsel %vm693_vm2, %v1088_v12, 0.0  ;;  %v1133_v38 = vmul.f32 %v1088_v12, %v1088_v12  ;;  %v1148_v42 = vsel %vm693_vm2, %v1134_v34, 0.0 }
  0xff   : > { %v1117_v43 = vadd.f32 %v1116_v37, %v1115_v36 }
 0x100   : > { %v675_v61 = vpop.permute.xlu1 %674  ;;  %v673_v62 = vpop.permute.xlu0 %672  ;;  %v1146_v41 = vsel %vm693_vm2, %v1133_v38, 0.0 }
 0x101   : > { %v755_v22 = vsel %vm747_vm8, %v746_v59, %v675_v61  ;;  %v754_v63 = vsel %vm747_vm8, %v745_v60, %v673_v62  ;;  %v1147_v44 = vadd.f32 %v1146_v41, %v1145_v40  ;;  %v1119_v45 = vadd.f32 %v1118_v39, %v1117_v43 }
 0x102   : > { %1482 = vmatprep.mubr.msk.f32.mxu0 %vm761_vm9, %v754_v63 }
 0x103   : > { %1483 = vmatmul.mubr.msk.f32.gmra.mrb[6].mxu0 %vm761_vm9, %v755_v22  ;;  %v1149_v46 = vadd.f32 %v1148_v42, %v1147_v44  ;;  %v1120_v47 = vrot.slane %v1119_v45, 4 }
 0x105   : > { %v1150_v49 = vrot.slane %v1149_v46, 4  ;;  %v1121_v50 = vadd.f32 %v1120_v47, %v1119_v45 }
 0x107   : > { %v1151_v51 = vadd.f32 %v1150_v49, %v1149_v46  ;;  %v1122_v52 = vrot.slane %v1121_v50, 2 }
 0x109   : > { %v1152_v53 = vrot.slane %v1151_v51, 2  ;;  %v1123_v54 = vadd.f32 %v1122_v52, %v1121_v50 }
 0x10b   : > { %v1153_v56 = vadd.f32 %v1152_v53, %v1151_v51  ;;  %v1124_v48 = vrot.slane %v1123_v54, 1 }
 0x10d   : > { %v1154_v55 = vrot.slane %v1153_v56, 1  ;;  %v1125_v57 = vadd.f32 %v1124_v48, %v1123_v54 }
 0x10f   : > { %v1155_v58 = vadd.f32 %v1154_v55, %v1153_v56  ;;  %1126 = vst.msk [vmem:[%s347_s17] sm:$0x1] %vm924_vm10, %v1125_v57 }
 0x111   : > { %1156 = vst.msk [vmem:[%s350_s20] sm:$0x1] %vm924_vm10, %v1155_v58 }
 0x189   : > { %v1475_v59 = vpop.f32.mrb[0].mxu0 }
 0x18a   : > { %896 = vst.msk [vmem:[%s1908_s23 + $0x8] sm:$0xff] %vm693_vm2, %v1475_v59  ;;  %v904_v60 = vsel %vm693_vm2, %v1475_v59, 0.0  ;;  %v927_v61 = vmul.f32 %v1475_v59, %v1475_v59  ;;  %v856_v62 = vpop.f32.mrb[1].mxu0 }
 0x18b   : > { %895 = vst.msk [vmem:[%s1908_s23] sm:$0xff] %vm693_vm2, %v856_v62  ;;  %v903_v22 = vsel %vm693_vm2, %v856_v62, 0.0  ;;  %v926_v63 = vmul.f32 %v856_v62, %v856_v62 }
 0x18c   : > { %v935_v0 = vsel %vm693_vm2, %v927_v61, 0.0  ;;  %v905_v1 = vadd.f32 %v904_v60, %v903_v22 }
 0x18d   : > { %v934_v2 = vsel %vm693_vm2, %v926_v63, 0.0 }
 0x18e   : > { %v936_v3 = vadd.f32 %v935_v0, %v934_v2 }
 0x1a9   : > { %v1478_v4 = vpop.f32.mrb[2].mxu0 }
 0x1aa   : > { %898 = vst.msk [vmem:[%s1908_s23 + $0x18] sm:$0xff] %vm693_vm2, %v1478_v4  ;;  %v866_v6 = vpop.f32.mrb[3].mxu0  ;;  %v929_v7 = vmul.f32 %v1478_v4, %v1478_v4  ;;  %v908_v5 = vsel %vm693_vm2, %v1478_v4, 0.0 }
 0x1ab   : > { %897 = vst.msk [vmem:[%s1908_s23 + $0x10] sm:$0xff] %vm693_vm2, %v866_v6  ;;  %v906_v8 = vsel %vm693_vm2, %v866_v6, 0.0  ;;  %v928_v10 = vmul.f32 %v866_v6, %v866_v6 }
 0x1ac   : > { %v907_v31 = vadd.f32 %v906_v8, %v905_v1  ;;  %v939_v14 = vsel %vm693_vm2, %v929_v7, 0.0 }
 0x1ad   : > { %v937_v9 = vsel %vm693_vm2, %v928_v10, 0.0 }
 0x1ae   : > { %v938_v11 = vadd.f32 %v937_v9, %v936_v3  ;;  %v909_v13 = vadd.f32 %v908_v5, %v907_v31 }
 0x1b0   : > { %v940_v15 = vadd.f32 %v939_v14, %v938_v11 }
 0x1c9   : > { %v1481_v16 = vpop.f32.mrb[4].mxu0 }
 0x1ca   : > { %900 = vst.msk [vmem:[%s1908_s23 + $0x28] sm:$0xff] %vm693_vm2, %v1481_v16  ;;  %v876_v17 = vpop.f32.mrb[5].mxu0  ;;  %v931_v18 = vmul.f32 %v1481_v16, %v1481_v16  ;;  %v912_v23 = vsel %vm693_vm2, %v1481_v16, 0.0 }
 0x1cb   : > { %899 = vst.msk [vmem:[%s1908_s23 + $0x20] sm:$0xff] %vm693_vm2, %v876_v17  ;;  %v910_v19 = vsel %vm693_vm2, %v876_v17, 0.0  ;;  %v930_v20 = vmul.f32 %v876_v17, %v876_v17 }
 0x1cc   : > { %v911_v21 = vadd.f32 %v910_v19, %v909_v13  ;;  %v943_v27 = vsel %vm693_vm2, %v931_v18, 0.0 }
 0x1cd   : > { %v941_v24 = vsel %vm693_vm2, %v930_v20, 0.0 }
 0x1ce   : > { %v942_v25 = vadd.f32 %v941_v24, %v940_v15  ;;  %v913_v26 = vadd.f32 %v912_v23, %v911_v21 }
 0x1d0   : > { %v944_v28 = vadd.f32 %v943_v27, %v942_v25 }
 0x1d6   : > { %v1484_v29 = vpop.f32.mrb[6].mxu0 }
 0x1d7   : > { %902 = vst.msk [vmem:[%s1908_s23 + $0x38] sm:$0xff] %vm693_vm2, %v1484_v29  ;;  %v886_v30 = vpop.f32.mrb[7].mxu0  ;;  %v933_v35 = vmul.f32 %v1484_v29, %v1484_v29  ;;  %v916_v12 = vsel %vm693_vm2, %v1484_v29, 0.0 }
 0x1d8   : > { %901 = vst.msk [vmem:[%s1908_s23 + $0x30] sm:$0xff] %vm693_vm2, %v886_v30  ;;  %v914_v32 = vsel %vm693_vm2, %v886_v30, 0.0  ;;  %v932_v33 = vmul.f32 %v886_v30, %v886_v30 }
 0x1d9   : > { %v915_v34 = vadd.f32 %v914_v32, %v913_v26  ;;  %v947_v39 = vsel %vm693_vm2, %v933_v35, 0.0 }
 0x1da   : > { %v945_v36 = vsel %vm693_vm2, %v932_v33, 0.0 }
 0x1db   : > { %v917_v37 = vadd.f32 %v916_v12, %v915_v34  ;;  %v946_v38 = vadd.f32 %v945_v36, %v944_v28 }
 0x1dd   : > { %v918_v40 = vrot.slane %v917_v37, 4  ;;  %v948_v42 = vadd.f32 %v947_v39, %v946_v38 }
 0x1df   : > { %v919_v43 = vadd.f32 %v918_v40, %v917_v37  ;;  %v949_v41 = vrot.slane %v948_v42, 4 }
 0x1e1   : > { %v920_v44 = vrot.slane %v919_v43, 2  ;;  %v950_v45 = vadd.f32 %v949_v41, %v948_v42 }
 0x1e3   : > { %v921_v46 = vadd.f32 %v920_v44, %v919_v43  ;;  %v951_v47 = vrot.slane %v950_v45, 2 }
 0x1e5   : > { %v922_v49 = vrot.slane %v921_v46, 1  ;;  %v952_v50 = vadd.f32 %v951_v47, %v950_v45 }
 0x1e7   : > { %v923_v51 = vadd.f32 %v922_v49, %v921_v46  ;;  %v953_v52 = vrot.slane %v952_v50, 1 }
 0x1e9   : > { %925 = vst.msk [vmem:[%s336_s26] sm:$0x1] %vm924_vm10, %v923_v51  ;;  %v954_v53 = vadd.f32 %v953_v52, %v952_v50 }
 0x1eb   : > { %955 = vst.msk [vmem:[%s339_s9] sm:$0x1] %vm924_vm10, %v954_v53 }
 0x1ec PF: > { %s19_s27 = sadd.s32 1, %s1530_s27  }
 0x1ed   : > { %p16_p4 = scmp.ge.s32.totalorder %s19_s27, 4  }
 0x1ef   :  { %18 = sbr.rel (!%p16_p4) target bundleno = 1 (0x1), region = 127 }

</bundles_post_ra>
